<compile_context>
chip_gen: v7x
topology: tpu7x:2x2x1
jax: 0.10.0
libtpu: 0.0.40
codegen_flags: <defaults>
</compile_context>

<pallas_src>
import functools

import jax
import jax.numpy as jnp
from jax.experimental import pallas as pl
from jax.experimental.pallas import tpu as pltpu

PAD = 0           # Constants.PAD
NEG_INF = -1e9
LANE = 128
VMEM_LIMIT = 64 * 1024 * 1024


def _round_up(x, m):
    return ((x + m - 1) // m) * m


def _full_spec(arr):
    """Whole-array block, resident across the grid (constant block index)."""
    return pl.BlockSpec(arr.shape, lambda b, _nd=arr.ndim: (0,) * _nd)


def _ln(y, g, b):
    mu = jnp.mean(y, axis=-1, keepdims=True)
    var = jnp.mean((y - mu) ** 2, axis=-1, keepdims=True)
    return (y - mu) * jax.lax.rsqrt(var + 1e-5) * g + b


# --------------------------------------------------------------------------
# Fused encoder layer: QKV -> MHA -> out-proj + add&LN -> FFN + add&LN
# --------------------------------------------------------------------------
def _encoder_layer_kernel(seq_ref, x_ref, wqkv_ref, bqkv_ref, wfc_ref, bfc_ref,
                          ln1g_ref, ln1b_ref, w1_ref, b1_ref, w2_ref, b2_ref,
                          ln2g_ref, ln2b_ref, o_ref, qkv_ref,
                          *, n_head, d_k, d_v, scale):
    x = x_ref[0]                                  # (L, D) f32
    key_pad = seq_ref[0] == PAD                   # (1, L) bool, broadcast over queries

    # Fused QKV projection, kept in VMEM scratch (per-head slices read back as loads).
    qkv_ref[...] = (jnp.dot(x, wqkv_ref[...], preferred_element_type=jnp.float32)
                    + bqkv_ref[...])
    hdk = n_head * d_k

    # Multi-head attention; the output projection is accumulated per head
    # (sum_h o_h @ W_fc[h]) which is identical to concat-then-matmul.
    proj = None
    for h in range(n_head):
        q = qkv_ref[:, h * d_k:(h + 1) * d_k]                       # (L, d_k)
        k = qkv_ref[:, hdk + h * d_k: hdk + (h + 1) * d_k]          # (L, d_k)
        v = qkv_ref[:, 2 * hdk + h * d_v: 2 * hdk + (h + 1) * d_v]  # (L, d_v)
        s = jnp.dot(q, k.T, preferred_element_type=jnp.float32) * scale
        s = jnp.where(key_pad, NEG_INF, s)
        s = s - jnp.max(s, axis=-1, keepdims=True)
        p = jnp.exp(s)
        p = p * pl.reciprocal(jnp.sum(p, axis=-1, keepdims=True), approx=True)
        o_h = jnp.dot(p, v, preferred_element_type=jnp.float32)     # (L, d_v)
        c_h = jnp.dot(o_h, wfc_ref[h * d_v:(h + 1) * d_v, :],
                      preferred_element_type=jnp.float32)           # (L, D)
        proj = c_h if proj is None else proj + c_h
    proj = proj + bfc_ref[...]

    # Post-norm residual block 1.
    y = _ln(proj + x, ln1g_ref[...], ln1b_ref[...])

    # FFN (w1 + ReLU + w2) + residual + LayerNorm, all fused.
    h1 = jnp.maximum(
        jnp.dot(y, w1_ref[...], preferred_element_type=jnp.float32) + b1_ref[...], 0.0)
    h2 = jnp.dot(h1, w2_ref[...], preferred_element_type=jnp.float32) + b2_ref[...]
    o_ref[0] = _ln(h2 + y, ln2g_ref[...], ln2b_ref[...]).astype(o_ref.dtype)


def encoder_layer(x, seq3, p, cfg):
    """x: (Bt, L, D), seq3: (Bt, 1, L) int32 key ids. One grid step per batch element."""
    Bt, L, D = x.shape
    n_head, d_k, d_v = cfg["n_head"], cfg["d_k"], cfg["d_v"]
    qkv_width = 2 * n_head * d_k + n_head * d_v
    kern = functools.partial(_encoder_layer_kernel, n_head=n_head, d_k=d_k, d_v=d_v,
                             scale=float(d_k) ** -0.5)
    return pl.pallas_call(
        kern,
        out_shape=jax.ShapeDtypeStruct((Bt, L, D), jnp.float32),
        grid=(Bt,),
        in_specs=[
            pl.BlockSpec((1, 1, L), lambda b: (b, 0, 0)),   # key ids -> in-kernel pad mask
            pl.BlockSpec((1, L, D), lambda b: (b, 0, 0)),   # activations
            _full_spec(p["w_qkv"]), _full_spec(p["b_qkv"]),
            _full_spec(p["w_fc"]), _full_spec(p["b_fc"]),
            _full_spec(p["ln1_g"]), _full_spec(p["ln1_b"]),
            _full_spec(p["w1"]), _full_spec(p["b1"]),
            _full_spec(p["w2"]), _full_spec(p["b2"]),
            _full_spec(p["ln2_g"]), _full_spec(p["ln2_b"]),
        ],
        out_specs=pl.BlockSpec((1, L, D), lambda b: (b, 0, 0)),
        scratch_shapes=[pltpu.VMEM((L, qkv_width), jnp.float32)],
        compiler_params=pltpu.CompilerParams(
            dimension_semantics=("parallel",), vmem_limit_bytes=VMEM_LIMIT),
    )(seq3, x, p["w_qkv"], p["b_qkv"], p["w_fc"], p["b_fc"], p["ln1_g"], p["ln1_b"],
      p["w1"], p["b1"], p["w2"], p["b2"], p["ln2_g"], p["ln2_b"])


def bert_encoder(x, seq, layers, cfg):
    Bt, L, _ = x.shape
    seq3 = seq.reshape(Bt, 1, L).astype(jnp.int32)
    for p in layers:
        x = encoder_layer(x, seq3, p, cfg)
    return x


# --------------------------------------------------------------------------
# Fused cross-attention + MaskDiff head (lane-padded output)
# --------------------------------------------------------------------------
def _cross_attn_diff_kernel(kseq_ref, q_ref, k_ref, v_ref, wd_ref, bd_ref, o_ref, *, scale):
    q = q_ref[0]                                  # (Lq, D)
    k = k_ref[0]                                  # (Lk, D)
    v = v_ref[0]                                  # (Lk, D)
    key_pad = kseq_ref[0] == PAD                  # (1, Lk)
    s = jnp.dot(q, k.T, preferred_element_type=jnp.float32) * scale
    s = jnp.where(key_pad, NEG_INF, s)
    s = s - jnp.max(s, axis=-1, keepdims=True)
    p = jnp.exp(s)
    p = p * pl.reciprocal(jnp.sum(p, axis=-1, keepdims=True), approx=True)
    ctx = jnp.dot(p, v, preferred_element_type=jnp.float32)          # (Lq, D)
    o_ref[0] = (jnp.dot(ctx, wd_ref[...], preferred_element_type=jnp.float32)
                + bd_ref[...]).astype(o_ref.dtype)


def cross_attn_diff_head(q, k, v, key_seq, wd, bd, d_model):
    B, Lq, D = q.shape
    Lk = k.shape[1]
    N = wd.shape[1]
    Np = _round_up(N, LANE)                       # lane-dense output, slice afterwards
    wd_p = jnp.pad(wd, ((0, 0), (0, Np - N)))
    bd_p = jnp.pad(bd, (0, Np - N)).reshape(1, Np)
    kseq = key_seq.reshape(B, 1, Lk).astype(jnp.int32)
    out = pl.pallas_call(
        functools.partial(_cross_attn_diff_kernel, scale=float(d_model) ** -0.5),
        out_shape=jax.ShapeDtypeStruct((B, Lq, Np), jnp.float32),
        grid=(B,),
        in_specs=[
            pl.BlockSpec((1, 1, Lk), lambda b: (b, 0, 0)),
            pl.BlockSpec((1, Lq, D), lambda b: (b, 0, 0)),
            pl.BlockSpec((1, Lk, D), lambda b: (b, 0, 0)),
            pl.BlockSpec((1, Lk, D), lambda b: (b, 0, 0)),
            _full_spec(wd_p), _full_spec(bd_p),
        ],
        out_specs=pl.BlockSpec((1, Lq, Np), lambda b: (b, 0, 0)),
        compiler_params=pltpu.CompilerParams(
            dimension_semantics=("parallel",), vmem_limit_bytes=VMEM_LIMIT),
    )(kseq, q, k, v, wd_p, bd_p)
    return out[:, :, :N]


# --------------------------------------------------------------------------
# Tiled dense (used for the two vocab heads) — lane-dense padded output
# --------------------------------------------------------------------------
def _dense_kernel(x_ref, w_ref, b_ref, o_ref, acc_ref, *, act, nk):
    @pl.when(pl.program_id(2) == 0)
    def _init():
        acc_ref[...] = jnp.zeros_like(acc_ref)

    acc_ref[...] += jnp.dot(x_ref[...], w_ref[...], preferred_element_type=jnp.float32)

    @pl.when(pl.program_id(2) == nk - 1)
    def _fin():
        y = acc_ref[...] + b_ref[...]
        if act == "relu":
            y = jnp.maximum(y, 0.0)
        o_ref[...] = y.astype(o_ref.dtype)


def tiled_dense(x, w, b, act="none", tm_default=256, tn_default=256):
    """x:(M,K) @ w:(K,N) + b:(N,) with K-grid accumulator; N padded to 128 lanes."""
    M, K = x.shape
    N = w.shape[1]
    tm = min(tm_default, _round_up(M, 8))
    tn = min(tn_default, _round_up(N, LANE))
    if K % LANE == 0:
        tk = 512 if K % 512 == 0 else (256 if K % 256 == 0 else 128)
    else:
        tk = K                                     # full-K block when K is not 128-aligned
    Mp, Np = _round_up(M, tm), _round_up(N, tn)
    xp = x if Mp == M else jnp.pad(x, ((0, Mp - M), (0, 0)))
    wp = w if Np == N else jnp.pad(w, ((0, 0), (0, Np - N)))
    bp = (b if Np == N else jnp.pad(b, (0, Np - N))).reshape(1, Np)
    nk = K // tk
    out = pl.pallas_call(
        functools.partial(_dense_kernel, act=act, nk=nk),
        out_shape=jax.ShapeDtypeStruct((Mp, Np), jnp.float32),
        grid=(Mp // tm, Np // tn, nk),
        in_specs=[
            pl.BlockSpec((tm, tk), lambda i, j, k: (i, k)),
            pl.BlockSpec((tk, tn), lambda i, j, k: (k, j)),
            pl.BlockSpec((1, tn), lambda i, j, k: (0, j)),
        ],
        out_specs=pl.BlockSpec((tm, tn), lambda i, j, k: (i, j)),
        scratch_shapes=[pltpu.VMEM((tm, tn), jnp.float32)],
        compiler_params=pltpu.CompilerParams(
            dimension_semantics=("parallel", "parallel", "arbitrary"),
            vmem_limit_bytes=VMEM_LIMIT),
    )(xp, wp, bp)
    return out[:M, :N] if (Mp, Np) != (M, N) else out


def linear_head(x, w, b):
    B, L, D = x.shape
    y = tiled_dense(x.reshape(B * L, D), w, b)
    return y.reshape(B, L, w.shape[1])


# --------------------------------------------------------------------------
# Embedding (gather kept in plain JAX) and full model forward
# --------------------------------------------------------------------------
def bert_embedding(q_seq, s_seq, p):
    # TODO(synk): BERTEmbedding internals reconstructed (token + learned positional).
    L = q_seq.shape[1]
    q_emb = jnp.take(p["q_tok"], q_seq, axis=0) + p["pos"][:L][None, :, :]
    s_emb = jnp.take(p["s_tok"], s_seq, axis=0) + p["pos"][:L][None, :, :]
    return q_emb, s_emb


def bert_model_forward(params, mask_question, mask_skill, question, total_skill, cfg):
    B = mask_question.shape[0]
    d_model = cfg["d_model"]

    mask_q_emb, mask_s_emb = bert_embedding(mask_question, mask_skill, params["embed"])
    q_emb, s_emb = bert_embedding(question, total_skill, params["embed"])

    # Batch the two passes through each shared-weight encoder (halves launches/weight DMA).
    q_x = jnp.concatenate([mask_q_emb, q_emb], axis=0)
    q_seq = jnp.concatenate([mask_question, question], axis=0)
    s_x = jnp.concatenate([mask_s_emb, s_emb], axis=0)
    s_seq = jnp.concatenate([mask_skill, total_skill], axis=0)

    q_out = bert_encoder(q_x, q_seq, params["bert_q"], cfg)
    s_out = bert_encoder(s_x, s_seq, params["bert_s"], cfg)

    out_mask_q_emb, out_q_emb = q_out[:B], q_out[B:]
    out_mask_s_emb, out_s_emb = s_out[:B], s_out[B:]

    # Cross-attention (temperature sqrt(d_model)) fused with the MaskDiff head.
    seq_logit_diff_q = cross_attn_diff_head(
        out_q_emb, out_s_emb, out_s_emb, total_skill,
        params["head_d_w"], params["head_d_b"], d_model)

    seq_logit_mask_ques = linear_head(out_mask_q_emb, params["head_q_w"], params["head_q_b"])
    seq_logit_mask_skill = linear_head(out_mask_s_emb, params["head_s_w"], params["head_s_b"])
    return seq_logit_mask_ques, seq_logit_mask_skill, seq_logit_diff_q


# --------------------------------------------------------------------------
# Deterministic parameter initialization
# --------------------------------------------------------------------------
def _init_layer(key, d_model, d_inner, n_head, d_k, d_v):
    ks = jax.random.split(key, 6)
    s = 0.02
    w_qs = jax.random.normal(ks[0], (d_model, n_head * d_k), jnp.float32) * s
    w_ks = jax.random.normal(ks[1], (d_model, n_head * d_k), jnp.float32) * s
    w_vs = jax.random.normal(ks[2], (d_model, n_head * d_v), jnp.float32) * s
    qkv_width = 2 * n_head * d_k + n_head * d_v
    return dict(
        # Fused QKV weight, columns = [Q heads | K heads | V heads]
        w_qkv=jnp.concatenate([w_qs, w_ks, w_vs], axis=1),
        b_qkv=jnp.zeros((1, qkv_width), jnp.float32),
        w_fc=jax.random.normal(ks[3], (n_head * d_v, d_model), jnp.float32) * s,
        b_fc=jnp.zeros((1, d_model), jnp.float32),
        ln1_g=jnp.ones((1, d_model), jnp.float32),
        ln1_b=jnp.zeros((1, d_model), jnp.float32),
        w1=jax.random.normal(ks[4], (d_model, d_inner), jnp.float32) * s,
        b1=jnp.zeros((1, d_inner), jnp.float32),
        w2=jax.random.normal(ks[5], (d_inner, d_model), jnp.float32) * s,
        b2=jnp.zeros((1, d_model), jnp.float32),
        ln2_g=jnp.ones((1, d_model), jnp.float32),
        ln2_b=jnp.zeros((1, d_model), jnp.float32),
    )


def init_params(key, cfg):
    q_size, s_size = cfg["q_size"], cfg["s_size"]
    d_model, n_layers = cfg["d_model"], cfg["n_layers"]
    d_k, d_v, n_head, d_inner = cfg["d_k"], cfg["d_v"], cfg["n_head"], cfg["d_inner"]
    ks = jax.random.split(key, 8 + 2 * n_layers)
    s = 0.02
    return dict(
        embed=dict(
            q_tok=jax.random.normal(ks[0], (q_size + 5, d_model), jnp.float32) * s,
            s_tok=jax.random.normal(ks[1], (s_size + 5, d_model), jnp.float32) * s,
            pos=jax.random.normal(ks[2], (cfg["max_len"], d_model), jnp.float32) * s,
        ),
        bert_q=[_init_layer(ks[3 + i], d_model, d_inner, n_head, d_k, d_v)
                for i in range(n_layers)],
        bert_s=[_init_layer(ks[3 + n_layers + i], d_model, d_inner, n_head, d_k, d_v)
                for i in range(n_layers)],
        head_q_w=jax.random.normal(ks[3 + 2 * n_layers], (d_model, q_size + 1), jnp.float32) * s,
        head_q_b=jnp.zeros((q_size + 1,), jnp.float32),
        head_s_w=jax.random.normal(ks[4 + 2 * n_layers], (d_model, s_size + 1), jnp.float32) * s,
        head_s_b=jnp.zeros((s_size + 1,), jnp.float32),
        head_d_w=jax.random.normal(ks[5 + 2 * n_layers], (d_model, 1), jnp.float32) * s,
        head_d_b=jnp.zeros((1,), jnp.float32),
    )


# --------------------------------------------------------------------------
# Demo
# --------------------------------------------------------------------------
if __name__ == "__main__":
    cfg = dict(q_size=20, s_size=10, d_model=32, n_layers=2, d_k=16, d_v=16,
               n_head=2, d_inner=64, dropout=0.1, max_len=64)
    B, L = 2, 8

    key = jax.random.PRNGKey(0)
    k_par, k_mq, k_ms, k_q, k_s = jax.random.split(key, 5)
    params = init_params(k_par, cfg)

    # Integer id sequences; last positions padded with PAD=0 to exercise masking.
    mask_question = jax.random.randint(k_mq, (B, L), 1, cfg["q_size"] + 5, jnp.int32)
    mask_skill = jax.random.randint(k_ms, (B, L), 1, cfg["s_size"] + 5, jnp.int32)
    question = jax.random.randint(k_q, (B, L), 1, cfg["q_size"] + 5, jnp.int32)
    total_skill = jax.random.randint(k_s, (B, L), 1, cfg["s_size"] + 5, jnp.int32)
    pad_tail = jnp.concatenate(
        [jnp.ones((B, L - 2), jnp.int32), jnp.zeros((B, 2), jnp.int32)], axis=1)
    mask_question = mask_question * pad_tail
    mask_skill = mask_skill * pad_tail
    question = question * pad_tail
    total_skill = total_skill * pad_tail

    fwd = jax.jit(functools.partial(bert_model_forward, cfg=cfg))
    out_q, out_s, out_d = fwd(params, mask_question, mask_skill, question, total_skill)
    jax.block_until_ready((out_q, out_s, out_d))

    assert out_q.shape == (B, L, cfg["q_size"] + 1)
    assert out_s.shape == (B, L, cfg["s_size"] + 1)
    assert out_d.shape == (B, L, 1)
    assert jnp.all(jnp.isfinite(out_q)) and jnp.all(jnp.isfinite(out_s)) and jnp.all(
        jnp.isfinite(out_d))
    print("KERNEL_OK")
</pallas_src>

<mosaic_0001>
module attributes {stable_mosaic.version = 11 : i64} {
  func.func @_cross_attn_diff_kernel(%arg0: i32, %arg1: memref<1x1x8xi32, #tpu.memory_space<vmem>>, %arg2: memref<1x8x32xf32, #tpu.memory_space<vmem>>, %arg3: memref<1x8x32xf32, #tpu.memory_space<vmem>>, %arg4: memref<1x8x32xf32, #tpu.memory_space<vmem>>, %arg5: memref<32x128xf32, #tpu.memory_space<vmem>>, %arg6: memref<1x128xf32, #tpu.memory_space<vmem>>, %arg7: memref<1x8x128xf32, #tpu.memory_space<vmem>>) attributes {dimension_semantics = [#tpu.dimension_semantics<parallel>], iteration_bounds = array<i64: 2>, scalar_prefetch = 0 : i64, scratch_operands = 0 : i64, tpu.core_type = #tpu.core_type<tc>, window_params = [{transform_indices = @transform_0, window_bounds = array<i64: 1, 1, 8>}, {transform_indices = @transform_1, window_bounds = array<i64: 1, 8, 32>}, {transform_indices = @transform_2, window_bounds = array<i64: 1, 8, 32>}, {transform_indices = @transform_3, window_bounds = array<i64: 1, 8, 32>}, {pipeline_mode = #tpu.pipeline_mode<synchronous>, transform_indices = @transform_4, window_bounds = array<i64: 32, 128>}, {pipeline_mode = #tpu.pipeline_mode<synchronous>, transform_indices = @transform_5, window_bounds = array<i64: 1, 128>}, {transform_indices = @transform_6, window_bounds = array<i64: 1, 8, 128>}]} {
    %c0 = arith.constant 0 : index
    %c0_0 = arith.constant 0 : index
    %c0_1 = arith.constant 0 : index
    %0 = vector.load %arg2[%c0, %c0_0, %c0_1] : memref<1x8x32xf32, #tpu.memory_space<vmem>>, vector<1x8x32xf32>
    %1 = vector.shape_cast %0 : vector<1x8x32xf32> to vector<8x32xf32>
    %c0_2 = arith.constant 0 : index
    %c0_3 = arith.constant 0 : index
    %c0_4 = arith.constant 0 : index
    %2 = vector.load %arg3[%c0_2, %c0_3, %c0_4] : memref<1x8x32xf32, #tpu.memory_space<vmem>>, vector<1x8x32xf32>
    %3 = vector.shape_cast %2 : vector<1x8x32xf32> to vector<8x32xf32>
    %c0_5 = arith.constant 0 : index
    %c0_6 = arith.constant 0 : index
    %c0_7 = arith.constant 0 : index
    %4 = vector.load %arg4[%c0_5, %c0_6, %c0_7] : memref<1x8x32xf32, #tpu.memory_space<vmem>>, vector<1x8x32xf32>
    %5 = vector.shape_cast %4 : vector<1x8x32xf32> to vector<8x32xf32>
    %c0_8 = arith.constant 0 : index
    %c0_9 = arith.constant 0 : index
    %c0_10 = arith.constant 0 : index
    %6 = vector.load %arg1[%c0_8, %c0_9, %c0_10] : memref<1x1x8xi32, #tpu.memory_space<vmem>>, vector<1x1x8xi32>
    %7 = vector.shape_cast %6 : vector<1x1x8xi32> to vector<1x8xi32>
    %c0_i32 = arith.constant 0 : i32
    %8 = vector.broadcast %c0_i32 : i32 to vector<1x8xi32>
    %9 = arith.cmpi eq, %7, %8 : vector<1x8xi32>
    %10 = tpu.transpose %3, [1, 0] : vector<8x32xf32> -> vector<32x8xf32>
    %cst = arith.constant dense<0.000000e+00> : vector<8x8xf32>
    %11 = tpu.matmul %1, %10, %cst {dimension_numbers = #tpu.dot_dimension_numbers<[1], [0], [0], [1], [0, 0, 1, 1], [], []>} : vector<8x32xf32>, vector<32x8xf32>, vector<8x8xf32> -> vector<8x8xf32>
    %cst_11 = arith.constant 0.176776692 : f32
    %12 = vector.broadcast %cst_11 : f32 to vector<8x8xf32>
    %13 = arith.mulf %11, %12 : vector<8x8xf32>
    %cst_12 = arith.constant -1.000000e+09 : f32
    %14 = vector.shape_cast %9 : vector<1x8xi1> to vector<1x8xi1>
    %15 = vector.broadcast %14 : vector<1x8xi1> to vector<8x8xi1>
    %16 = vector.broadcast %cst_12 : f32 to vector<8x8xf32>
    %17 = arith.select %15, %16, %13 : vector<8x8xi1>, vector<8x8xf32>
    %cst_13 = arith.constant dense<0xFF800000> : vector<8xf32>
    %18 = vector.multi_reduction <maximumf>, %17, %cst_13 [1] : vector<8x8xf32> to vector<8xf32>
    %19 = vector.shape_cast %18 : vector<8xf32> to vector<8x1xf32>
    %20 = vector.broadcast %19 : vector<8x1xf32> to vector<8x8xf32>
    %21 = arith.subf %17, %20 : vector<8x8xf32>
    %22 = math.exp %21 : vector<8x8xf32>
    %cst_14 = arith.constant dense<0.000000e+00> : vector<8xf32>
    %23 = vector.multi_reduction <add>, %22, %cst_14 [1] : vector<8x8xf32> to vector<8xf32>
    %24 = vector.shape_cast %23 : vector<8xf32> to vector<8x1xf32>
    %25 = tpu.reciprocal %24 {approx = true} : vector<8x1xf32> -> vector<8x1xf32>
    %26 = vector.broadcast %25 : vector<8x1xf32> to vector<8x8xf32>
    %27 = arith.mulf %22, %26 : vector<8x8xf32>
    %cst_15 = arith.constant dense<0.000000e+00> : vector<8x32xf32>
    %28 = tpu.matmul %27, %5, %cst_15 {dimension_numbers = #tpu.dot_dimension_numbers<[1], [0], [0], [1], [0, 0, 1, 1], [], []>} : vector<8x8xf32>, vector<8x32xf32>, vector<8x32xf32> -> vector<8x32xf32>
    %c0_16 = arith.constant 0 : index
    %c0_17 = arith.constant 0 : index
    %29 = vector.load %arg5[%c0_16, %c0_17] : memref<32x128xf32, #tpu.memory_space<vmem>>, vector<32x128xf32>
    %cst_18 = arith.constant dense<0.000000e+00> : vector<8x128xf32>
    %30 = tpu.matmul %28, %29, %cst_18 {dimension_numbers = #tpu.dot_dimension_numbers<[1], [0], [0], [1], [0, 0, 1, 1], [], []>} : vector<8x32xf32>, vector<32x128xf32>, vector<8x128xf32> -> vector<8x128xf32>
    %c0_19 = arith.constant 0 : index
    %c0_20 = arith.constant 0 : index
    %31 = vector.load %arg6[%c0_19, %c0_20] : memref<1x128xf32, #tpu.memory_space<vmem>>, vector<1x128xf32>
    %32 = vector.broadcast %31 : vector<1x128xf32> to vector<8x128xf32>
    %33 = arith.addf %30, %32 : vector<8x128xf32>
    %c0_21 = arith.constant 0 : index
    %c0_22 = arith.constant 0 : index
    %c0_23 = arith.constant 0 : index
    %34 = vector.load %arg7[%c0_21, %c0_22, %c0_23] : memref<1x8x128xf32, #tpu.memory_space<vmem>>, vector<1x8x128xf32>
    %35 = vector.shape_cast %34 : vector<1x8x128xf32> to vector<8x128xf32>
    %36 = vector.shape_cast %33 : vector<8x128xf32> to vector<1x8x128xf32>
    tpu.vector_store %arg7[%c0_21, %c0_22, %c0_23], %36 {strides = array<i32>} : memref<1x8x128xf32, #tpu.memory_space<vmem>>, vector<1x8x128xf32>,
    return
  }
  func.func @transform_0(%arg0: i32) -> (i32, i32, i32) {
    %c0_i32 = arith.constant 0 : i32
    %c0_i32_0 = arith.constant 0 : i32
    %c0_i32_1 = arith.constant 0 : i32
    return %arg0, %c0_i32, %c0_i32_0 : i32, i32, i32
  }
  func.func @transform_1(%arg0: i32) -> (i32, i32, i32) {
    %c0_i32 = arith.constant 0 : i32
    %c0_i32_0 = arith.constant 0 : i32
    %c0_i32_1 = arith.constant 0 : i32
    return %arg0, %c0_i32, %c0_i32_0 : i32, i32, i32
  }
  func.func @transform_2(%arg0: i32) -> (i32, i32, i32) {
    %c0_i32 = arith.constant 0 : i32
    %c0_i32_0 = arith.constant 0 : i32
    %c0_i32_1 = arith.constant 0 : i32
    return %arg0, %c0_i32, %c0_i32_0 : i32, i32, i32
  }
  func.func @transform_3(%arg0: i32) -> (i32, i32, i32) {
    %c0_i32 = arith.constant 0 : i32
    %c0_i32_0 = arith.constant 0 : i32
    %c0_i32_1 = arith.constant 0 : i32
    return %arg0, %c0_i32, %c0_i32_0 : i32, i32, i32
  }
  func.func @transform_4(%arg0: i32) -> (i32, i32) {
    %c0_i32 = arith.constant 0 : i32
    %c0_i32_0 = arith.constant 0 : i32
    %c0_i32_1 = arith.constant 0 : i32
    return %c0_i32, %c0_i32_0 : i32, i32
  }
  func.func @transform_5(%arg0: i32) -> (i32, i32) {
    %c0_i32 = arith.constant 0 : i32
    %c0_i32_0 = arith.constant 0 : i32
    %c0_i32_1 = arith.constant 0 : i32
    return %c0_i32, %c0_i32_0 : i32, i32
  }
  func.func @transform_6(%arg0: i32) -> (i32, i32, i32) {
    %c0_i32 = arith.constant 0 : i32
    %c0_i32_0 = arith.constant 0 : i32
    %c0_i32_1 = arith.constant 0 : i32
    return %arg0, %c0_i32, %c0_i32_0 : i32, i32, i32
  }
}

module attributes {stable_mosaic.version = 11 : i64} {
  func.func @_encoder_layer_kernel(%arg0: i32, %arg1: memref<1x1x8xi32, #tpu.memory_space<vmem>>, %arg2: memref<1x8x32xf32, #tpu.memory_space<vmem>>, %arg3: memref<32x96xf32, #tpu.memory_space<vmem>>, %arg4: memref<1x96xf32, #tpu.memory_space<vmem>>, %arg5: memref<32x32xf32, #tpu.memory_space<vmem>>, %arg6: memref<1x32xf32, #tpu.memory_space<vmem>>, %arg7: memref<1x32xf32, #tpu.memory_space<vmem>>, %arg8: memref<1x32xf32, #tpu.memory_space<vmem>>, %arg9: memref<32x64xf32, #tpu.memory_space<vmem>>, %arg10: memref<1x64xf32, #tpu.memory_space<vmem>>, %arg11: memref<64x32xf32, #tpu.memory_space<vmem>>, %arg12: memref<1x32xf32, #tpu.memory_space<vmem>>, %arg13: memref<1x32xf32, #tpu.memory_space<vmem>>, %arg14: memref<1x32xf32, #tpu.memory_space<vmem>>, %arg15: memref<1x8x32xf32, #tpu.memory_space<vmem>>, %arg16: memref<8x96xf32, #tpu.memory_space<vmem>>) attributes {dimension_semantics = [#tpu.dimension_semantics<parallel>], iteration_bounds = array<i64: 4>, scalar_prefetch = 0 : i64, scratch_operands = 1 : i64, tpu.core_type = #tpu.core_type<tc>, window_params = [{transform_indices = @transform_0, window_bounds = array<i64: 1, 1, 8>}, {transform_indices = @transform_1, window_bounds = array<i64: 1, 8, 32>}, {pipeline_mode = #tpu.pipeline_mode<synchronous>, transform_indices = @transform_2, window_bounds = array<i64: 32, 96>}, {pipeline_mode = #tpu.pipeline_mode<synchronous>, transform_indices = @transform_3, window_bounds = array<i64: 1, 96>}, {pipeline_mode = #tpu.pipeline_mode<synchronous>, transform_indices = @transform_4, window_bounds = array<i64: 32, 32>}, {pipeline_mode = #tpu.pipeline_mode<synchronous>, transform_indices = @transform_5, window_bounds = array<i64: 1, 32>}, {pipeline_mode = #tpu.pipeline_mode<synchronous>, transform_indices = @transform_6, window_bounds = array<i64: 1, 32>}, {pipeline_mode = #tpu.pipeline_mode<synchronous>, transform_indices = @transform_7, window_bounds = array<i64: 1, 32>}, {pipeline_mode = #tpu.pipeline_mode<synchronous>, transform_indices = @transform_8, window_bounds = array<i64: 32, 64>}, {pipeline_mode = #tpu.pipeline_mode<synchronous>, transform_indices = @transform_9, window_bounds = array<i64: 1, 64>}, {pipeline_mode = #tpu.pipeline_mode<synchronous>, transform_indices = @transform_10, window_bounds = array<i64: 64, 32>}, {pipeline_mode = #tpu.pipeline_mode<synchronous>, transform_indices = @transform_11, window_bounds = array<i64: 1, 32>}, {pipeline_mode = #tpu.pipeline_mode<synchronous>, transform_indices = @transform_12, window_bounds = array<i64: 1, 32>}, {pipeline_mode = #tpu.pipeline_mode<synchronous>, transform_indices = @transform_13, window_bounds = array<i64: 1, 32>}, {transform_indices = @transform_14, window_bounds = array<i64: 1, 8, 32>}]} {
    %c0 = arith.constant 0 : index
    %c0_0 = arith.constant 0 : index
    %c0_1 = arith.constant 0 : index
    %0 = vector.load %arg2[%c0, %c0_0, %c0_1] : memref<1x8x32xf32, #tpu.memory_space<vmem>>, vector<1x8x32xf32>
    %1 = vector.shape_cast %0 : vector<1x8x32xf32> to vector<8x32xf32>
    %c0_2 = arith.constant 0 : index
    %c0_3 = arith.constant 0 : index
    %c0_4 = arith.constant 0 : index
    %2 = vector.load %arg1[%c0_2, %c0_3, %c0_4] : memref<1x1x8xi32, #tpu.memory_space<vmem>>, vector<1x1x8xi32>
    %3 = vector.shape_cast %2 : vector<1x1x8xi32> to vector<1x8xi32>
    %c0_i32 = arith.constant 0 : i32
    %4 = vector.broadcast %c0_i32 : i32 to vector<1x8xi32>
    %5 = arith.cmpi eq, %3, %4 : vector<1x8xi32>
    %c0_5 = arith.constant 0 : index
    %c0_6 = arith.constant 0 : index
    %6 = vector.load %arg3[%c0_5, %c0_6] : memref<32x96xf32, #tpu.memory_space<vmem>>, vector<32x96xf32>
    %cst = arith.constant dense<0.000000e+00> : vector<8x96xf32>
    %7 = tpu.matmul %1, %6, %cst {dimension_numbers = #tpu.dot_dimension_numbers<[1], [0], [0], [1], [0, 0, 1, 1], [], []>} : vector<8x32xf32>, vector<32x96xf32>, vector<8x96xf32> -> vector<8x96xf32>
    %c0_7 = arith.constant 0 : index
    %c0_8 = arith.constant 0 : index
    %8 = vector.load %arg4[%c0_7, %c0_8] : memref<1x96xf32, #tpu.memory_space<vmem>>, vector<1x96xf32>
    %9 = vector.broadcast %8 : vector<1x96xf32> to vector<8x96xf32>
    %10 = arith.addf %7, %9 : vector<8x96xf32>
    %c0_9 = arith.constant 0 : index
    %c0_10 = arith.constant 0 : index
    %11 = vector.load %arg16[%c0_9, %c0_10] : memref<8x96xf32, #tpu.memory_space<vmem>>, vector<8x96xf32>
    tpu.vector_store %arg16[%c0_9, %c0_10], %10 {strides = array<i32>} : memref<8x96xf32, #tpu.memory_space<vmem>>, vector<8x96xf32>,
    %c0_11 = arith.constant 0 : index
    %c0_12 = arith.constant 0 : index
    %12 = vector.load %arg16[%c0_11, %c0_12] : memref<8x96xf32, #tpu.memory_space<vmem>>, vector<8x16xf32>
    %c0_13 = arith.constant 0 : index
    %c32 = arith.constant 32 : index
    %13 = vector.load %arg16[%c0_13, %c32] : memref<8x96xf32, #tpu.memory_space<vmem>>, vector<8x16xf32>
    %c0_14 = arith.constant 0 : index
    %c64 = arith.constant 64 : index
    %14 = vector.load %arg16[%c0_14, %c64] : memref<8x96xf32, #tpu.memory_space<vmem>>, vector<8x16xf32>
    %15 = tpu.transpose %13, [1, 0] : vector<8x16xf32> -> vector<16x8xf32>
    %cst_15 = arith.constant dense<0.000000e+00> : vector<8x8xf32>
    %16 = tpu.matmul %12, %15, %cst_15 {dimension_numbers = #tpu.dot_dimension_numbers<[1], [0], [0], [1], [0, 0, 1, 1], [], []>} : vector<8x16xf32>, vector<16x8xf32>, vector<8x8xf32> -> vector<8x8xf32>
    %cst_16 = arith.constant 2.500000e-01 : f32
    %17 = vector.broadcast %cst_16 : f32 to vector<8x8xf32>
    %18 = arith.mulf %16, %17 : vector<8x8xf32>
    %cst_17 = arith.constant -1.000000e+09 : f32
    %19 = vector.shape_cast %5 : vector<1x8xi1> to vector<1x8xi1>
    %20 = vector.broadcast %19 : vector<1x8xi1> to vector<8x8xi1>
    %21 = vector.broadcast %cst_17 : f32 to vector<8x8xf32>
    %22 = arith.select %20, %21, %18 : vector<8x8xi1>, vector<8x8xf32>
    %cst_18 = arith.constant dense<0xFF800000> : vector<8xf32>
    %23 = vector.multi_reduction <maximumf>, %22, %cst_18 [1] : vector<8x8xf32> to vector<8xf32>
    %24 = vector.shape_cast %23 : vector<8xf32> to vector<8x1xf32>
    %25 = vector.broadcast %24 : vector<8x1xf32> to vector<8x8xf32>
    %26 = arith.subf %22, %25 : vector<8x8xf32>
    %27 = math.exp %26 : vector<8x8xf32>
    %cst_19 = arith.constant dense<0.000000e+00> : vector<8xf32>
    %28 = vector.multi_reduction <add>, %27, %cst_19 [1] : vector<8x8xf32> to vector<8xf32>
    %29 = vector.shape_cast %28 : vector<8xf32> to vector<8x1xf32>
    %30 = tpu.reciprocal %29 {approx = true} : vector<8x1xf32> -> vector<8x1xf32>
    %31 = vector.broadcast %30 : vector<8x1xf32> to vector<8x8xf32>
    %32 = arith.mulf %27, %31 : vector<8x8xf32>
    %cst_20 = arith.constant dense<0.000000e+00> : vector<8x16xf32>
    %33 = tpu.matmul %32, %14, %cst_20 {dimension_numbers = #tpu.dot_dimension_numbers<[1], [0], [0], [1], [0, 0, 1, 1], [], []>} : vector<8x8xf32>, vector<8x16xf32>, vector<8x16xf32> -> vector<8x16xf32>
    %c0_21 = arith.constant 0 : index
    %c0_22 = arith.constant 0 : index
    %34 = vector.load %arg5[%c0_21, %c0_22] : memref<32x32xf32, #tpu.memory_space<vmem>>, vector<16x32xf32>
    %cst_23 = arith.constant dense<0.000000e+00> : vector<8x32xf32>
    %35 = tpu.matmul %33, %34, %cst_23 {dimension_numbers = #tpu.dot_dimension_numbers<[1], [0], [0], [1], [0, 0, 1, 1], [], []>} : vector<8x16xf32>, vector<16x32xf32>, vector<8x32xf32> -> vector<8x32xf32>
    %c0_24 = arith.constant 0 : index
    %c16 = arith.constant 16 : index
    %36 = vector.load %arg16[%c0_24, %c16] : memref<8x96xf32, #tpu.memory_space<vmem>>, vector<8x16xf32>
    %c0_25 = arith.constant 0 : index
    %c48 = arith.constant 48 : index
    %37 = vector.load %arg16[%c0_25, %c48] : memref<8x96xf32, #tpu.memory_space<vmem>>, vector<8x16xf32>
    %c0_26 = arith.constant 0 : index
    %c80 = arith.constant 80 : index
    %38 = vector.load %arg16[%c0_26, %c80] : memref<8x96xf32, #tpu.memory_space<vmem>>, vector<8x16xf32>
    %39 = tpu.transpose %37, [1, 0] : vector<8x16xf32> -> vector<16x8xf32>
    %cst_27 = arith.constant dense<0.000000e+00> : vector<8x8xf32>
    %40 = tpu.matmul %36, %39, %cst_27 {dimension_numbers = #tpu.dot_dimension_numbers<[1], [0], [0], [1], [0, 0, 1, 1], [], []>} : vector<8x16xf32>, vector<16x8xf32>, vector<8x8xf32> -> vector<8x8xf32>
    %cst_28 = arith.constant 2.500000e-01 : f32
    %41 = vector.broadcast %cst_28 : f32 to vector<8x8xf32>
    %42 = arith.mulf %40, %41 : vector<8x8xf32>
    %cst_29 = arith.constant -1.000000e+09 : f32
    %43 = vector.shape_cast %5 : vector<1x8xi1> to vector<1x8xi1>
    %44 = vector.broadcast %43 : vector<1x8xi1> to vector<8x8xi1>
    %45 = vector.broadcast %cst_29 : f32 to vector<8x8xf32>
    %46 = arith.select %44, %45, %42 : vector<8x8xi1>, vector<8x8xf32>
    %cst_30 = arith.constant dense<0xFF800000> : vector<8xf32>
    %47 = vector.multi_reduction <maximumf>, %46, %cst_30 [1] : vector<8x8xf32> to vector<8xf32>
    %48 = vector.shape_cast %47 : vector<8xf32> to vector<8x1xf32>
    %49 = vector.broadcast %48 : vector<8x1xf32> to vector<8x8xf32>
    %50 = arith.subf %46, %49 : vector<8x8xf32>
    %51 = math.exp %50 : vector<8x8xf32>
    %cst_31 = arith.constant dense<0.000000e+00> : vector<8xf32>
    %52 = vector.multi_reduction <add>, %51, %cst_31 [1] : vector<8x8xf32> to vector<8xf32>
    %53 = vector.shape_cast %52 : vector<8xf32> to vector<8x1xf32>
    %54 = tpu.reciprocal %53 {approx = true} : vector<8x1xf32> -> vector<8x1xf32>
    %55 = vector.broadcast %54 : vector<8x1xf32> to vector<8x8xf32>
    %56 = arith.mulf %51, %55 : vector<8x8xf32>
    %cst_32 = arith.constant dense<0.000000e+00> : vector<8x16xf32>
    %57 = tpu.matmul %56, %38, %cst_32 {dimension_numbers = #tpu.dot_dimension_numbers<[1], [0], [0], [1], [0, 0, 1, 1], [], []>} : vector<8x8xf32>, vector<8x16xf32>, vector<8x16xf32> -> vector<8x16xf32>
    %c16_33 = arith.constant 16 : index
    %c0_34 = arith.constant 0 : index
    %58 = vector.load %arg5[%c16_33, %c0_34] : memref<32x32xf32, #tpu.memory_space<vmem>>, vector<16x32xf32>
    %cst_35 = arith.constant dense<0.000000e+00> : vector<8x32xf32>
    %59 = tpu.matmul %57, %58, %cst_35 {dimension_numbers = #tpu.dot_dimension_numbers<[1], [0], [0], [1], [0, 0, 1, 1], [], []>} : vector<8x16xf32>, vector<16x32xf32>, vector<8x32xf32> -> vector<8x32xf32>
    %60 = arith.addf %35, %59 : vector<8x32xf32>
    %c0_36 = arith.constant 0 : index
    %c0_37 = arith.constant 0 : index
    %61 = vector.load %arg6[%c0_36, %c0_37] : memref<1x32xf32, #tpu.memory_space<vmem>>, vector<1x32xf32>
    %62 = vector.broadcast %61 : vector<1x32xf32> to vector<8x32xf32>
    %63 = arith.addf %60, %62 : vector<8x32xf32>
    %64 = arith.addf %63, %1 : vector<8x32xf32>
    %c0_38 = arith.constant 0 : index
    %c0_39 = arith.constant 0 : index
    %65 = vector.load %arg7[%c0_38, %c0_39] : memref<1x32xf32, #tpu.memory_space<vmem>>, vector<1x32xf32>
    %c0_40 = arith.constant 0 : index
    %c0_41 = arith.constant 0 : index
    %66 = vector.load %arg8[%c0_40, %c0_41] : memref<1x32xf32, #tpu.memory_space<vmem>>, vector<1x32xf32>
    %cst_42 = arith.constant dense<0.000000e+00> : vector<8xf32>
    %67 = vector.multi_reduction <add>, %64, %cst_42 [1] : vector<8x32xf32> to vector<8xf32>
    %68 = vector.shape_cast %67 : vector<8xf32> to vector<8x1xf32>
    %cst_43 = arith.constant 3.200000e+01 : f32
    %69 = vector.broadcast %cst_43 : f32 to vector<8x1xf32>
    %70 = arith.divf %68, %69 : vector<8x1xf32>
    %71 = vector.broadcast %70 : vector<8x1xf32> to vector<8x32xf32>
    %72 = arith.subf %64, %71 : vector<8x32xf32>
    %73 = arith.mulf %72, %72 : vector<8x32xf32>
    %cst_44 = arith.constant dense<0.000000e+00> : vector<8xf32>
    %74 = vector.multi_reduction <add>, %73, %cst_44 [1] : vector<8x32xf32> to vector<8xf32>
    %75 = vector.shape_cast %74 : vector<8xf32> to vector<8x1xf32>
    %cst_45 = arith.constant 3.200000e+01 : f32
    %76 = vector.broadcast %cst_45 : f32 to vector<8x1xf32>
    %77 = arith.divf %75, %76 : vector<8x1xf32>
    %78 = vector.broadcast %70 : vector<8x1xf32> to vector<8x32xf32>
    %79 = arith.subf %64, %78 : vector<8x32xf32>
    %cst_46 = arith.constant 9.99999974E-6 : f32
    %80 = vector.broadcast %cst_46 : f32 to vector<8x1xf32>
    %81 = arith.addf %77, %80 : vector<8x1xf32>
    %82 = math.rsqrt %81 : vector<8x1xf32>
    %83 = vector.broadcast %82 : vector<8x1xf32> to vector<8x32xf32>
    %84 = arith.mulf %79, %83 : vector<8x32xf32>
    %85 = vector.broadcast %65 : vector<1x32xf32> to vector<8x32xf32>
    %86 = arith.mulf %84, %85 : vector<8x32xf32>
    %87 = vector.broadcast %66 : vector<1x32xf32> to vector<8x32xf32>
    %88 = arith.addf %86, %87 : vector<8x32xf32>
    %c0_47 = arith.constant 0 : index
    %c0_48 = arith.constant 0 : index
    %89 = vector.load %arg9[%c0_47, %c0_48] : memref<32x64xf32, #tpu.memory_space<vmem>>, vector<32x64xf32>
    %cst_49 = arith.constant dense<0.000000e+00> : vector<8x64xf32>
    %90 = tpu.matmul %88, %89, %cst_49 {dimension_numbers = #tpu.dot_dimension_numbers<[1], [0], [0], [1], [0, 0, 1, 1], [], []>} : vector<8x32xf32>, vector<32x64xf32>, vector<8x64xf32> -> vector<8x64xf32>
    %c0_50 = arith.constant 0 : index
    %c0_51 = arith.constant 0 : index
    %91 = vector.load %arg10[%c0_50, %c0_51] : memref<1x64xf32, #tpu.memory_space<vmem>>, vector<1x64xf32>
    %92 = vector.broadcast %91 : vector<1x64xf32> to vector<8x64xf32>
    %93 = arith.addf %90, %92 : vector<8x64xf32>
    %cst_52 = arith.constant 0.000000e+00 : f32
    %94 = vector.broadcast %cst_52 : f32 to vector<8x64xf32>
    %95 = arith.maximumf %93, %94 : vector<8x64xf32>
    %c0_53 = arith.constant 0 : index
    %c0_54 = arith.constant 0 : index
    %96 = vector.load %arg11[%c0_53, %c0_54] : memref<64x32xf32, #tpu.memory_space<vmem>>, vector<64x32xf32>
    %cst_55 = arith.constant dense<0.000000e+00> : vector<8x32xf32>
    %97 = tpu.matmul %95, %96, %cst_55 {dimension_numbers = #tpu.dot_dimension_numbers<[1], [0], [0], [1], [0, 0, 1, 1], [], []>} : vector<8x64xf32>, vector<64x32xf32>, vector<8x32xf32> -> vector<8x32xf32>
    %c0_56 = arith.constant 0 : index
    %c0_57 = arith.constant 0 : index
    %98 = vector.load %arg12[%c0_56, %c0_57] : memref<1x32xf32, #tpu.memory_space<vmem>>, vector<1x32xf32>
    %99 = vector.broadcast %98 : vector<1x32xf32> to vector<8x32xf32>
    %100 = arith.addf %97, %99 : vector<8x32xf32>
    %101 = arith.addf %100, %88 : vector<8x32xf32>
    %c0_58 = arith.constant 0 : index
    %c0_59 = arith.constant 0 : index
    %102 = vector.load %arg13[%c0_58, %c0_59] : memref<1x32xf32, #tpu.memory_space<vmem>>, vector<1x32xf32>
    %c0_60 = arith.constant 0 : index
    %c0_61 = arith.constant 0 : index
    %103 = vector.load %arg14[%c0_60, %c0_61] : memref<1x32xf32, #tpu.memory_space<vmem>>, vector<1x32xf32>
    %cst_62 = arith.constant dense<0.000000e+00> : vector<8xf32>
    %104 = vector.multi_reduction <add>, %101, %cst_62 [1] : vector<8x32xf32> to vector<8xf32>
    %105 = vector.shape_cast %104 : vector<8xf32> to vector<8x1xf32>
    %cst_63 = arith.constant 3.200000e+01 : f32
    %106 = vector.broadcast %cst_63 : f32 to vector<8x1xf32>
    %107 = arith.divf %105, %106 : vector<8x1xf32>
    %108 = vector.broadcast %107 : vector<8x1xf32> to vector<8x32xf32>
    %109 = arith.subf %101, %108 : vector<8x32xf32>
    %110 = arith.mulf %109, %109 : vector<8x32xf32>
    %cst_64 = arith.constant dense<0.000000e+00> : vector<8xf32>
    %111 = vector.multi_reduction <add>, %110, %cst_64 [1] : vector<8x32xf32> to vector<8xf32>
    %112 = vector.shape_cast %111 : vector<8xf32> to vector<8x1xf32>
    %cst_65 = arith.constant 3.200000e+01 : f32
    %113 = vector.broadcast %cst_65 : f32 to vector<8x1xf32>
    %114 = arith.divf %112, %113 : vector<8x1xf32>
    %115 = vector.broadcast %107 : vector<8x1xf32> to vector<8x32xf32>
    %116 = arith.subf %101, %115 : vector<8x32xf32>
    %cst_66 = arith.constant 9.99999974E-6 : f32
    %117 = vector.broadcast %cst_66 : f32 to vector<8x1xf32>
    %118 = arith.addf %114, %117 : vector<8x1xf32>
    %119 = math.rsqrt %118 : vector<8x1xf32>
    %120 = vector.broadcast %119 : vector<8x1xf32> to vector<8x32xf32>
    %121 = arith.mulf %116, %120 : vector<8x32xf32>
    %122 = vector.broadcast %102 : vector<1x32xf32> to vector<8x32xf32>
    %123 = arith.mulf %121, %122 : vector<8x32xf32>
    %124 = vector.broadcast %103 : vector<1x32xf32> to vector<8x32xf32>
    %125 = arith.addf %123, %124 : vector<8x32xf32>
    %c0_67 = arith.constant 0 : index
    %c0_68 = arith.constant 0 : index
    %c0_69 = arith.constant 0 : index
    %126 = vector.load %arg15[%c0_67, %c0_68, %c0_69] : memref<1x8x32xf32, #tpu.memory_space<vmem>>, vector<1x8x32xf32>
    %127 = vector.shape_cast %126 : vector<1x8x32xf32> to vector<8x32xf32>
    %128 = vector.shape_cast %125 : vector<8x32xf32> to vector<1x8x32xf32>
    tpu.vector_store %arg15[%c0_67, %c0_68, %c0_69], %128 {strides = array<i32>} : memref<1x8x32xf32, #tpu.memory_space<vmem>>, vector<1x8x32xf32>,
    return
  }
  func.func @transform_0(%arg0: i32) -> (i32, i32, i32) {
    %c0_i32 = arith.constant 0 : i32
    %c0_i32_0 = arith.constant 0 : i32
    %c0_i32_1 = arith.constant 0 : i32
    return %arg0, %c0_i32, %c0_i32_0 : i32, i32, i32
  }
  func.func @transform_1(%arg0: i32) -> (i32, i32, i32) {
    %c0_i32 = arith.constant 0 : i32
    %c0_i32_0 = arith.constant 0 : i32
    %c0_i32_1 = arith.constant 0 : i32
    return %arg0, %c0_i32, %c0_i32_0 : i32, i32, i32
  }
  func.func @transform_2(%arg0: i32) -> (i32, i32) {
    %c0_i32 = arith.constant 0 : i32
    %c0_i32_0 = arith.constant 0 : i32
    %c0_i32_1 = arith.constant 0 : i32
    return %c0_i32, %c0_i32_0 : i32, i32
  }
  func.func @transform_3(%arg0: i32) -> (i32, i32) {
    %c0_i32 = arith.constant 0 : i32
    %c0_i32_0 = arith.constant 0 : i32
    %c0_i32_1 = arith.constant 0 : i32
    return %c0_i32, %c0_i32_0 : i32, i32
  }
  func.func @transform_4(%arg0: i32) -> (i32, i32) {
    %c0_i32 = arith.constant 0 : i32
    %c0_i32_0 = arith.constant 0 : i32
    %c0_i32_1 = arith.constant 0 : i32
    return %c0_i32, %c0_i32_0 : i32, i32
  }
  func.func @transform_5(%arg0: i32) -> (i32, i32) {
    %c0_i32 = arith.constant 0 : i32
    %c0_i32_0 = arith.constant 0 : i32
    %c0_i32_1 = arith.constant 0 : i32
    return %c0_i32, %c0_i32_0 : i32, i32
  }
  func.func @transform_6(%arg0: i32) -> (i32, i32) {
    %c0_i32 = arith.constant 0 : i32
    %c0_i32_0 = arith.constant 0 : i32
    %c0_i32_1 = arith.constant 0 : i32
    return %c0_i32, %c0_i32_0 : i32, i32
  }
  func.func @transform_7(%arg0: i32) -> (i32, i32) {
    %c0_i32 = arith.constant 0 : i32
    %c0_i32_0 = arith.constant 0 : i32
    %c0_i32_1 = arith.constant 0 : i32
    return %c0_i32, %c0_i32_0 : i32, i32
  }
  func.func @transform_8(%arg0: i32) -> (i32, i32) {
    %c0_i32 = arith.constant 0 : i32
    %c0_i32_0 = arith.constant 0 : i32
    %c0_i32_1 = arith.constant 0 : i32
    return %c0_i32, %c0_i32_0 : i32, i32
  }
  func.func @transform_9(%arg0: i32) -> (i32, i32) {
    %c0_i32 = arith.constant 0 : i32
    %c0_i32_0 = arith.constant 0 : i32
    %c0_i32_1 = arith.constant 0 : i32
    return %c0_i32, %c0_i32_0 : i32, i32
  }
  func.func @transform_10(%arg0: i32) -> (i32, i32) {
    %c0_i32 = arith.constant 0 : i32
    %c0_i32_0 = arith.constant 0 : i32
    %c0_i32_1 = arith.constant 0 : i32
    return %c0_i32, %c0_i32_0 : i32, i32
  }
  func.func @transform_11(%arg0: i32) -> (i32, i32) {
    %c0_i32 = arith.constant 0 : i32
    %c0_i32_0 = arith.constant 0 : i32
    %c0_i32_1 = arith.constant 0 : i32
    return %c0_i32, %c0_i32_0 : i32, i32
  }
  func.func @transform_12(%arg0: i32) -> (i32, i32) {
    %c0_i32 = arith.constant 0 : i32
    %c0_i32_0 = arith.constant 0 : i32
    %c0_i32_1 = arith.constant 0 : i32
    return %c0_i32, %c0_i32_0 : i32, i32
  }
  func.func @transform_13(%arg0: i32) -> (i32, i32) {
    %c0_i32 = arith.constant 0 : i32
    %c0_i32_0 = arith.constant 0 : i32
    %c0_i32_1 = arith.constant 0 : i32
    return %c0_i32, %c0_i32_0 : i32, i32
  }
  func.func @transform_14(%arg0: i32) -> (i32, i32, i32) {
    %c0_i32 = arith.constant 0 : i32
    %c0_i32_0 = arith.constant 0 : i32
    %c0_i32_1 = arith.constant 0 : i32
    return %arg0, %c0_i32, %c0_i32_0 : i32, i32, i32
  }
}

module attributes {stable_mosaic.version = 11 : i64} {
  func.func @_dense_kernel(%arg0: i32, %arg1: i32, %arg2: i32, %arg3: memref<16x32xf32, #tpu.memory_space<vmem>>, %arg4: memref<32x128xf32, #tpu.memory_space<vmem>>, %arg5: memref<1x128xf32, #tpu.memory_space<vmem>>, %arg6: memref<16x128xf32, #tpu.memory_space<vmem>>, %arg7: memref<16x128xf32, #tpu.memory_space<vmem>>) attributes {dimension_semantics = [#tpu.dimension_semantics<parallel>, #tpu.dimension_semantics<parallel>, #tpu.dimension_semantics<arbitrary>], iteration_bounds = array<i64: 1, 1, 1>, scalar_prefetch = 0 : i64, scratch_operands = 1 : i64, tpu.core_type = #tpu.core_type<tc>, window_params = [{transform_indices = @transform_0, window_bounds = array<i64: 16, 32>}, {transform_indices = @transform_1, window_bounds = array<i64: 32, 128>}, {transform_indices = @transform_2, window_bounds = array<i64: 1, 128>}, {transform_indices = @transform_3, window_bounds = array<i64: 16, 128>}]} {
    %c0_i32 = arith.constant 0 : i32
    %0 = arith.cmpi eq, %arg2, %c0_i32 : i32
    %1 = arith.extui %0 : i1 to i32
    %c0_i32_0 = arith.constant 0 : i32
    %2 = arith.cmpi ne, %1, %c0_i32_0 : i32
    scf.if %2 {
      %cst_10 = arith.constant 0.000000e+00 : f32
      %12 = vector.broadcast %cst_10 : f32 to vector<16x128xf32>
      %c0_11 = arith.constant 0 : index
      %c0_12 = arith.constant 0 : index
      %13 = vector.load %arg7[%c0_11, %c0_12] : memref<16x128xf32, #tpu.memory_space<vmem>>, vector<16x128xf32>
      tpu.vector_store %arg7[%c0_11, %c0_12], %12 {strides = array<i32>} : memref<16x128xf32, #tpu.memory_space<vmem>>, vector<16x128xf32>,
    } else {
    }
    %c0 = arith.constant 0 : index
    %c0_1 = arith.constant 0 : index
    %3 = vector.load %arg7[%c0, %c0_1] : memref<16x128xf32, #tpu.memory_space<vmem>>, vector<16x128xf32>
    %c0_2 = arith.constant 0 : index
    %c0_3 = arith.constant 0 : index
    %4 = vector.load %arg3[%c0_2, %c0_3] : memref<16x32xf32, #tpu.memory_space<vmem>>, vector<16x32xf32>
    %c0_4 = arith.constant 0 : index
    %c0_5 = arith.constant 0 : index
    %5 = vector.load %arg4[%c0_4, %c0_5] : memref<32x128xf32, #tpu.memory_space<vmem>>, vector<32x128xf32>
    %cst = arith.constant dense<0.000000e+00> : vector<16x128xf32>
    %6 = tpu.matmul %4, %5, %cst {dimension_numbers = #tpu.dot_dimension_numbers<[1], [0], [0], [1], [0, 0, 1, 1], [], []>} : vector<16x32xf32>, vector<32x128xf32>, vector<16x128xf32> -> vector<16x128xf32>
    %7 = arith.addf %3, %6 : vector<16x128xf32>
    %c0_6 = arith.constant 0 : index
    %c0_7 = arith.constant 0 : index
    %8 = vector.load %arg7[%c0_6, %c0_7] : memref<16x128xf32, #tpu.memory_space<vmem>>, vector<16x128xf32>
    tpu.vector_store %arg7[%c0_6, %c0_7], %7 {strides = array<i32>} : memref<16x128xf32, #tpu.memory_space<vmem>>, vector<16x128xf32>,
    %c0_i32_8 = arith.constant 0 : i32
    %9 = arith.cmpi eq, %arg2, %c0_i32_8 : i32
    %10 = arith.extui %9 : i1 to i32
    %c0_i32_9 = arith.constant 0 : i32
    %11 = arith.cmpi ne, %10, %c0_i32_9 : i32
    scf.if %11 {
      %c0_10 = arith.constant 0 : index
      %c0_11 = arith.constant 0 : index
      %12 = vector.load %arg7[%c0_10, %c0_11] : memref<16x128xf32, #tpu.memory_space<vmem>>, vector<16x128xf32>
      %c0_12 = arith.constant 0 : index
      %c0_13 = arith.constant 0 : index
      %13 = vector.load %arg5[%c0_12, %c0_13] : memref<1x128xf32, #tpu.memory_space<vmem>>, vector<1x128xf32>
      %14 = vector.broadcast %13 : vector<1x128xf32> to vector<16x128xf32>
      %15 = arith.addf %12, %14 : vector<16x128xf32>
      %c0_14 = arith.constant 0 : index
      %c0_15 = arith.constant 0 : index
      %16 = vector.load %arg6[%c0_14, %c0_15] : memref<16x128xf32, #tpu.memory_space<vmem>>, vector<16x128xf32>
      tpu.vector_store %arg6[%c0_14, %c0_15], %15 {strides = array<i32>} : memref<16x128xf32, #tpu.memory_space<vmem>>, vector<16x128xf32>,
    } else {
    }
    return
  }
  func.func @transform_0(%arg0: i32, %arg1: i32, %arg2: i32) -> (i32, i32) {
    %c0_i32 = arith.constant 0 : i32
    return %arg0, %arg2 : i32, i32
  }
  func.func @transform_1(%arg0: i32, %arg1: i32, %arg2: i32) -> (i32, i32) {
    %c0_i32 = arith.constant 0 : i32
    return %arg2, %arg1 : i32, i32
  }
  func.func @transform_2(%arg0: i32, %arg1: i32, %arg2: i32) -> (i32, i32) {
    %c0_i32 = arith.constant 0 : i32
    %c0_i32_0 = arith.constant 0 : i32
    return %c0_i32, %arg1 : i32, i32
  }
  func.func @transform_3(%arg0: i32, %arg1: i32, %arg2: i32) -> (i32, i32) {
    %c0_i32 = arith.constant 0 : i32
    return %arg0, %arg1 : i32, i32
  }
}

</mosaic_0001>

<bundles_post_ra>
// kernel: bert_model_forward.13
= control target key start
LH: loop header
LB: loop body
LE: loop exit
PB: predicated region body
PF: predicated region fallthrough
CT: control target
= control target key end

     0   :  { %8 = vsyncpa [#allocation4], 0  ;;  %s406_s0 = inlined_call_operand.hbm [shape: f32[16,32], index: 0, kind: input, shape index: {}]   ;;  %s407_s1 = inlined_call_operand.hbm [shape: f32[32,128], index: 1, kind: input, shape index: {}]   ;;  %s408_s2 = inlined_call_operand.hbm [shape: f32[1,128], index: 2, kind: input, shape index: {}]   ;;  %s409_s3 = inlined_call_operand.hbm [shape: f32[16,128], index: 3, kind: output, shape index: {}]  }
   0x1   :  { %9 = vsyncpa [#allocation7], 0 }
   0x2   :  { %10 = vsyncpa [#allocation5], 0  ;;  %s316_s12 = smov [#allocation6]   ;;  %s317_s14 = smov [#allocation3]  }
   0x3   :  { %s28_s13 = sshll.u32 %s316_s12, 4  ;;  %s16_s15 = sshll.u32 %s317_s14, 4  ;;  %s29_s13 = int_to_ptr.vmem [resolvable:$true] %s28_s13  ;;  %s342_s15 = int_to_ptr.vmem [resolvable:$true] %s16_s15 }
   0x4   :  { %s222_s18 = scalar_lea.hbm %s407_s1, 512 }
   0x5   :  { %p223_p0 = scmp.ne.s32.totalorder %s407_s1, %s222_s18  ;;  %p226_p1 = scmp.lt.u32.totalorder %s222_s18, %s407_s1 }
   0x7   :  { %p228_p2 = pnand %p226_p1, %p223_p0 }
   0x9   :  { %231 = shalt.err (!%p228_p2)
}
   0xa   :  { %s232_s23 = scalar_lea.vmem %s29_s13, 512  ;;  %p237_p4 = scmp.lt.s32.totalorder %s29_s13, %s29_s13 }
   0xb   :  { %p233_p3 = scmp.ne.s32.totalorder %s29_s13, %s232_s23  ;;  %p238_p5 = scmp.lt.s32.totalorder %s232_s23, %s232_s23 }
   0xd   :  { %p239_p6 = por %p238_p5, %p237_p4 }
   0xf   :  { %p240_p7 = pnand %p239_p6, %p233_p3 }
  0x11   :  { %243 = shalt.err (!%p240_p7)
}
  0x12   :  { %s318_s24 = smov 128   ;;  %s319_s25 = smov 8  }
  0x13   :  { %34 = dma.hbm_to_vmem [thread:$0]  %s407_s1, 512, %s29_s13, [#allocation7], %s318_s24, %s318_s24, %s319_s25  }
  0x14   :  { %s244_s30 = scalar_lea.hbm %s406_s0, 256 }
  0x15   :  { %p245_p8 = scmp.ne.s32.totalorder %s406_s0, %s244_s30  ;;  %p248_p9 = scmp.lt.u32.totalorder %s244_s30, %s406_s0 }
  0x17   :  { %p250_p10 = pnand %p248_p9, %p245_p8 }
  0x19   :  { %253 = shalt.err (!%p250_p10)
}
  0x1a   :  { %s254_s8 = scalar_lea.vmem %s342_s15, 256  ;;  %p259_p12 = scmp.lt.s32.totalorder %s342_s15, %s342_s15 }
  0x1b   :  { %p255_p11 = scmp.ne.s32.totalorder %s342_s15, %s254_s8  ;;  %p260_p13 = scmp.lt.s32.totalorder %s254_s8, %s254_s8 }
  0x1d   :  { %p261_p0 = por %p260_p13, %p259_p12 }
  0x1f   :  { %p262_p1 = pnand %p261_p0, %p255_p11 }
  0x21   :  { %265 = shalt.err (!%p262_p1)
}
  0x22   :  { %22 = dma.hbm_to_vmem [thread:$0]  %s406_s0, 256, %s342_s15, [#allocation4], %s318_s24, %s318_s24, %s319_s25  }
  0x23   :  { %s320_s10 = smov [#allocation8]   ;;  %s266_s14 = scalar_lea.hbm %s408_s2, 16 }
  0x24   :  { %s41_s11 = sshll.u32 %s320_s10, 4  ;;  %p267_p2 = scmp.ne.s32.totalorder %s408_s2, %s266_s14  ;;  %s42_s11 = int_to_ptr.vmem [resolvable:$true] %s41_s11 }
  0x25   :  { %p270_p3 = scmp.lt.u32.totalorder %s266_s14, %s408_s2 }
  0x27   :  { %p272_p4 = pnand %p270_p3, %p267_p2 }
  0x29   :  { %275 = shalt.err (!%p272_p4)
}
  0x2a   :  { %s276_s20 = scalar_lea.vmem %s42_s11, 16  ;;  %s280_s0 = scalar_lea.vmem %s42_s11, 32 }
  0x2b   :  { %p277_p5 = scmp.ne.s32.totalorder %s42_s11, %s276_s20  ;;  %p281_p6 = scmp.lt.s32.totalorder %s42_s11, %s42_s11 }
  0x2c   :  { %p282_p7 = scmp.lt.s32.totalorder %s280_s0, %s276_s20 }
  0x2e   :  { %p283_p8 = por %p282_p7, %p281_p6 }
  0x30   :  { %p284_p9 = pnand %p283_p8, %p277_p5 }
  0x32   :  { %287 = shalt.err (!%p284_p9)
}
  0x33   :  { %44 = dma.hbm_to_vmem [thread:$0]  %s408_s2, 16, %s42_s11, [#allocation7]  }
  0x34   :  { %310 = dma.done.wait [#allocation4], 256  }
  0x35   :  { %311 = vsyncadd [#allocation4], 4294967040 }
  0x36   :  { %312 = dma.done.wait [#allocation7], 528  }
  0x37   :  { %313 = vsyncadd [#allocation7], 4294966768  ;;  %vm68_vm0 = vcmask 261120   ;;  %v64_v0 = vld [vmem:[#allocation6] sm:$0xff]  ;;  %v65_v1 = vld [vmem:[#allocation6 + $0x8] sm:$0xff]  ;;  %s321_s2 = smov [#allocation9]  }
  0x38   :  { %v66_v2 = vld [vmem:[#allocation6 + $0x10] sm:$0xff]  ;;  %v208_v3 = vpack.c.bf16 %v65_v1, %v64_v0  ;;  %v67_v4 = vld [vmem:[#allocation6 + $0x18] sm:$0xff]  ;;  %v190_v8 = vld [vmem:[#allocation8] ss:$0 sm:$0xff]  ;;  %s175_s22 = sshll.u32 %s321_s2, 4  ;;  %s176_s22 = int_to_ptr.vmem [resolvable:$true] %s175_s22 }
  0x39   :  { %v62_v5 = vld [vmem:[#allocation3] sm:$0xff]  ;;  %v212_v6 = vpack.c.bf16 %v67_v4, %v66_v2  ;;  %v63_v7 = vld [vmem:[#allocation3 + $0x8] sm:$0xff]  ;;  %s288_s23 = scalar_lea.vmem %s176_s22, 256  ;;  %p293_p11 = scmp.lt.s32.totalorder %s176_s22, %s176_s22 }
  0x3a   :  { %205 = vmatprep.mubr.msk.f32.mxu0 %vm68_vm0, %v62_v5  ;;  %209 = vmatprep.subr.bf16.mxu0 %v208_v3  ;;  %p289_p10 = scmp.ne.s32.totalorder %s176_s22, %s288_s23  ;;  %p294_p12 = scmp.lt.s32.totalorder %s288_s23, %s288_s23 }
  0x3b   :  { %211 = vmatpush3.bf16.msra.mxu0 %v208_v3 }
  0x3c   :  { %213 = vmatprep.subr.bf16.mxu0 %v212_v6  ;;  %p295_p13 = por %p294_p12, %p293_p11 }
  0x3e   :  { %p296_p0 = pnand %p295_p13, %p289_p10 }
  0x3f   :  { %215 = vmatpush3.bf16.msra.mxu0 %v212_v6 }
  0x42   :  { %206 = vmatmul.mubr.msk.f32.vlgmr.msra.gmra.mrb[0].mxu0 %vm68_vm0, %v63_v7 }
 0x115   :  { %v207_v9 = vpop.f32.mrb[0].mxu0 }
 0x116   :  { %v167_v10 = vadd.f32 %v207_v9, %v190_v8  ;;  %v141_v11 = vpop.f32.mrb[1].mxu0 }
 0x117   :  { %v166_v12 = vadd.f32 %v190_v8, %v141_v11 }
 0x118   :  { %169 = vst [vmem:[#allocation9 + $0x8] sm:$0xff] %v167_v10 }
 0x119   :  { %168 = vst [vmem:[#allocation9] sm:$0xff] %v166_v12 }
 0x11a   :  { %299 = shalt.err (!%p296_p0)
}
 0x11b   :  { %s300_s28 = scalar_lea.hbm %s409_s3, 256 }
 0x11c   :  { %p301_p1 = scmp.ne.s32.totalorder %s409_s3, %s300_s28  ;;  %p304_p2 = scmp.lt.u32.totalorder %s300_s28, %s409_s3 }
 0x11e   :  { %p306_p3 = pnand %p304_p2, %p301_p1 }
 0x120   :  { %309 = shalt.err (!%p306_p3)
}
 0x121   :  { %181 = dma.vmem_to_hbm [thread:$0]  %s176_s22, 256, %s409_s3, [#allocation5], %s318_s24, %s318_s24, %s319_s25  }
 0x122   :  { %314 = dma.done.wait [#allocation5], 256  }
 0x123   :  { %315 = vsyncadd [#allocation5], 4294967040 }
 0x124   :  { %185 = vsyncpa [#allocation4], 1 }
 0x125   :  { %186 = vsyncpa [#allocation7], 1 }
 0x126   :  { %187 = vsyncpa [#allocation5], 1 }

// kernel: bert_model_forward.11
= control target key start
LH: loop header
LB: loop body
LE: loop exit
PB: predicated region body
PF: predicated region fallthrough
CT: control target
= control target key end

     0   :  { %s1634_s0 = inlined_call_operand.hbm [shape: s32[2,1,8], index: 0, kind: input, shape index: {}]   ;;  %s1635_s1 = inlined_call_operand.hbm [shape: f32[2,8,32], index: 1, kind: input, shape index: {}]   ;;  %s1636_s2 = inlined_call_operand.hbm [shape: f32[2,8,32], index: 2, kind: input, shape index: {}, may-alias: {2,3}]   ;;  %s1637_s3 = inlined_call_operand.hbm [shape: f32[2,8,32], index: 3, kind: input, shape index: {}, may-alias: {2,3}]   ;;  %s1638_s4 = inlined_call_operand.hbm [shape: f32[32,128], index: 4, kind: input, shape index: {}]   ;;  %s1639_s5 = inlined_call_operand.hbm [shape: f32[1,128], index: 5, kind: input, shape index: {}]   ;;  %s1640_s6 = inlined_call_operand.hbm [shape: f32[2,8,128], index: 6, kind: output, shape index: {}]  }
   0x1   :  { %1657 = sst [smem:[#allocation24_spill]] %s1635_s1 }
   0x2   :  { %1658 = sst [smem:[#allocation25_spill]] %s1638_s4 }
   0x3   :  { %11 = vsyncpa [#allocation3], 0 }
   0x4   :  { %13 = vsyncpa [#allocation3 + $0x1], 0 }
   0x5   :  { %14 = vsyncpa [#allocation6], 0 }
   0x6   :  { %16 = vsyncpa [#allocation6 + $0x1], 0 }
   0x7   :  { %17 = vsyncpa [#allocation9], 0 }
   0x8   :  { %19 = vsyncpa [#allocation9 + $0x1], 0 }
   0x9   :  { %20 = vsyncpa [#allocation12], 0 }
   0xa   :  { %21 = vsyncpa [#allocation4], 0 }
   0xb   :  { %23 = vsyncpa [#allocation4 + $0x1], 0  ;;  %s1289_s21 = smov 0   ;;  %s1291_s22 = smov 0  }
   0xc   :  { %s1293_s23 = smov 0   ;;  %s1295_s24 = smov 0  }
   0xd LB: > { %1659 = sst [smem:[#allocation20_spill]] %s1235_s23  ;;  %s1310_s25 = sadd.s32 4294967295, %s1239_s24   ;;  %s1239_s24 = sphi %s1295_s24, %s1691_s24   ;;  %s1235_s23 = sphi %s1293_s23, %s1693_s23   ;;  %s1231_s22 = sphi %s1291_s22, %s1695_s22   ;;  %s1227_s21 = sphi %s1289_s21, %s1694_s21  }
   0xe   : > { %s825_s26 = sadd.s32 4294967294, %s1239_s24   ;;  %p49_p0 = scmp.ne.s32.totalorder %s1231_s22, %s1227_s21 }
   0xf   : > { %p1641_p1 = scmp.eq.s32.totalorder %s1310_s25, 0  ;;  %p199_p3 = scmp.eq.s32.totalorder %s825_s26, 1 }
  0x10   : > { %p826_p5 = scmp.ge.s32.totalorder %s1239_s24, 1  ;;  %p206_p7 = scmp.lt.s32.totalorder %s1239_s24, 3 }
  0x11   : > { %p1319_p4 = por %p1641_p1, %p49_p0  ;;  %p1324_p6 = por %p199_p3, %p49_p0 }
  0x12   : > { %p1329_p8 = pnand %p826_p5, %p206_p7  ;;  %s1241_s30 = smov [#allocation10]  }
  0x13   : > { %s1660_s27 = scalar_select %p1319_p4, 1, 0 }
  0x14   : > { %s1661_s28 = scalar_select %p1324_p6, 1, 0 }
  0x15   : > { %s1663_s29 = scalar_select %p1329_p8, 1, 0 }
  0x16   : > { %1662 = sst [smem:[#allocation21_spill]] %s1661_s28  ;;  %s218_s7 = sshll.u32 %s1241_s30, 4  ;;  %s1333_s7 = int_to_ptr.vmem [resolvable:$true] %s218_s7 }
  0x17   : > { %p907_p9 = pneg %p1329_p8  ;;  %s1345_s9 = sadd.s32 1, %s1239_s24  }
  0x18   : > { %1665 = sst [smem:[#allocation22_spill]] %s1345_s9  ;;  %s36_s10 = sadd.s32 1, %s1235_s23 }
  0x19   : > { %p1340_p11 = pnand %p907_p9, %p1641_p1  ;;  %s33_s11 = ssub.s32 %s1239_s24, %s1345_s9 }
  0x1a   : > { %s1666_s4 = sld [smem:[#allocation25_spill]] }
  0x1b   : > { %s1664_s8 = scalar_select %p1340_p11, 1, 0 }
  0x1c   : > { %p1643_p13 = pneg %p1340_p11 }
  0x20   : > { %s981_s14 = scalar_lea.hbm %s1666_s4, 512 }
  0x21   : > { %p982_p12 = scmp.ne.s32.totalorder %s1666_s4, %s981_s14  ;;  %p988_p5 = scmp.lt.u32.totalorder %s981_s14, %s1666_s4 }
  0x23   : > { %p984_p0 = pnand %p1643_p13, %p982_p12 }
  0x25   : > { %p985_p3 = pneg %p984_p0 }
  0x27   : > { %p990_p7 = pnand %p988_p5, %p985_p3 }
  0x29   : > { %993 = shalt.err (!%p990_p7)
}
  0x2a   : > { %s994_s19 = scalar_lea.vmem %s1333_s7, 512  ;;  %p1002_p2 = scmp.lt.s32.totalorder %s1333_s7, %s1333_s7 }
  0x2b   : > { %p995_p9 = scmp.ne.s32.totalorder %s1333_s7, %s994_s19  ;;  %p1003_p12 = scmp.lt.s32.totalorder %s994_s19, %s994_s19 }
  0x2d   : > { %p997_p10 = pnand %p995_p9, %p1643_p13  ;;  %p1004_p0 = por %p1003_p12, %p1002_p2 }
  0x2f   : > { %p998_p1 = pneg %p997_p10 }
  0x31   : > { %p1005_p6 = pnand %p1004_p0, %p998_p1 }
  0x33   : > { %1008 = shalt.err (!%p1005_p6)
}
  0x34   : > { %s1242_s20 = smov 128   ;;  %s1243_s26 = smov 8  }
  0x35   : > { %910 = dma.hbm_to_vmem [thread:$0]  (!%p1340_p11), %s1666_s4, 512, %s1333_s7, [#allocation9], %s1242_s20, %s1242_s20, %s1243_s26  }
  0x36   : > { %p34_p1 = scmp.eq.s32.totalorder %s33_s11, 0  ;;  %p43_p2 = scmp.ne.s32.totalorder %s1235_s23, %s1231_s22 }
  0x37   : > { %p44_p6 = scmp.eq.s32.totalorder %s1239_s24, 0  ;;  %p933_p10 = scmp.lt.s32.totalorder %s1239_s24, 2 }
  0x38   : > { %s1382_s13 = scalar_select %p34_p1, %s1235_s23, %s36_s10  }
  0x39   : > { %p45_p3 = por %p44_p6, %p43_p2  ;;  %p1668_p5 = scmp.eq.s32.totalorder %s1310_s25, 1 }
  0x3a   : > { %1667 = sst [smem:[#allocation23_spill]] %s1382_s13  ;;  %s1391_s15 = sand.u32 1, %s1235_s23  }
  0x3b   : > { %p1386_p7 = por %p1668_p5, %p43_p2  ;;  %s1645_s16 = sand.u32 1, %s1239_s24  }
  0x3c   : > { %p1394_p9 = pnand %p933_p10, %p45_p3  ;;  %s1399_s7 = sshll.u32 %s1391_s15, 3 }
  0x3d   : > { %s1669_s14 = scalar_select %p1386_p7, 1, 0 }
  0x3e   : > { %s1670_s17 = scalar_select %p1394_p9, 1, 0 }
  0x3f   : > { %s1402_s10 = sshll.u32 %s1239_s24, 7  ;;  %s1671_s1 = sld [smem:[#allocation24_spill]] }
  0x40   : > { %s264_s20 = scalar_lea.vmem [#allocation5], %s1399_s7  ;;  %s1415_s30 = scalar_lea.sflag [#allocation6], %s1645_s16 }
  0x41   : > { %s271_s26 = sshll.u32 %s264_s20, 4  ;;  %p1421_p0 = pneg %p1394_p9  ;;  %s1411_s26 = int_to_ptr.vmem [resolvable:$true] %s271_s26 }
  0x43   : > { %s1672_s4 = scalar_select %p1421_p0, 1, 0 }
  0x45   : > { %s1408_s19 = scalar_lea.hbm %s1671_s1, %s1402_s10  ;;  %s1014_s20 = scalar_lea.hbm %s1671_s1, 256 }
  0x46   : > { %s1009_s12 = scalar_lea.hbm %s1408_s19, 128  ;;  %p1015_p6 = scmp.lt.u32.totalorder %s1408_s19, %s1671_s1 }
  0x47   : > { %p1010_p12 = scmp.ne.s32.totalorder %s1408_s19, %s1009_s12  ;;  %p1016_p10 = scmp.lt.u32.totalorder %s1014_s20, %s1009_s12 }
  0x48   : > { %p1018_p5 = scmp.lt.u32.totalorder %s1009_s12, %s1408_s19 }
  0x49   : > { %p1012_p1 = pnand %p1421_p0, %p1010_p12  ;;  %p1017_p3 = por %p1016_p10, %p1015_p6 }
  0x4b   : > { %p1013_p2 = pneg %p1012_p1  ;;  %p1019_p13 = por %p1018_p5, %p1017_p3 }
  0x4d   : > { %p1020_p7 = pnand %p1019_p13, %p1013_p2 }
  0x4f   : > { %1023 = shalt.err (!%p1020_p7)
}
  0x50   : > { %s1024_s16 = scalar_lea.vmem %s1411_s26, 128  ;;  %s1244_s11 = smov [#allocation5]  }
  0x51   : > { %p1025_p12 = scmp.ne.s32.totalorder %s1411_s26, %s1024_s16  ;;  %s1029_s18 = sshll.u32 %s1244_s11, 4  ;;  %s1030_s18 = int_to_ptr.vmem [resolvable:$false] %s1029_s18 }
  0x52   : > { %s1031_s23 = scalar_lea.vmem %s1030_s18, 256  ;;  %p1032_p8 = scmp.lt.s32.totalorder %s1411_s26, %s1030_s18 }
  0x53   : > { %p1027_p1 = pnand %p1025_p12, %p1421_p0  ;;  %p1033_p11 = scmp.lt.s32.totalorder %s1031_s23, %s1024_s16 }
  0x55   : > { %p1028_p4 = pneg %p1027_p1  ;;  %p1034_p6 = por %p1033_p11, %p1032_p8 }
  0x57   : > { %p1035_p10 = pnand %p1034_p6, %p1028_p4 }
  0x59   : > { %1038 = shalt.err (!%p1035_p10)
}
  0x5a   : > { %920 = dma.hbm_to_vmem [thread:$0]  (!%p1394_p9), %s1408_s19, 128, %s1411_s26, %s1415_s30  }
  0x5b   : > { %s1245_s13 = smov [#allocation11]   ;;  %s830_s20 = sshll.u32 %s1239_s24, 4 }
  0x5c   : > { %s232_s12 = sshll.u32 %s1245_s13, 4  ;;  %s1039_s18 = scalar_lea.hbm %s1639_s5, 16  ;;  %s233_s12 = int_to_ptr.vmem [resolvable:$true] %s232_s12 }
  0x5d   : > { %p1040_p4 = scmp.ne.s32.totalorder %s1639_s5, %s1039_s18  ;;  %p1673_p8 = scmp.ne.s32.totalorder %s1664_s8, 0 }
  0x5e   : > { %p1046_p2 = scmp.lt.u32.totalorder %s1039_s18, %s1639_s5 }
  0x5f   : > { %p1674_p11 = pneg %p1673_p8 }
  0x61   : > { %p1042_p13 = pnand %p1040_p4, %p1674_p11 }
  0x63   : > { %p1043_p7 = pneg %p1042_p13 }
  0x65   : > { %p1048_p3 = pnand %p1046_p2, %p1043_p7 }
  0x67   : > { %1051 = shalt.err (!%p1048_p3)
}
  0x68   : > { %s1052_s19 = scalar_lea.vmem %s233_s12, 16  ;;  %p1675_p12 = pmov %p1674_p11 }
  0x69   : > { %p1053_p5 = scmp.ne.s32.totalorder %s233_s12, %s1052_s19  ;;  %s1059_s1 = scalar_lea.vmem %s233_s12, 32 }
  0x6a   : > { %p1060_p10 = scmp.lt.s32.totalorder %s233_s12, %s233_s12  ;;  %p1061_p9 = scmp.lt.s32.totalorder %s1059_s1, %s1052_s19 }
  0x6b   : > { %p1055_p1 = pnand %p1053_p5, %p1675_p12 }
  0x6c   : > { %p1062_p0 = por %p1061_p9, %p1060_p10 }
  0x6d   : > { %p1056_p6 = pneg %p1055_p1 }
  0x6f   : > { %p1063_p4 = pnand %p1062_p0, %p1056_p6 }
  0x71   : > { %1066 = shalt.err (!%p1063_p4)
}
  0x72   : > { %913 = dma.hbm_to_vmem [thread:$0]  (!%p1673_p8), %s1639_s5, 16, %s233_s12, [#allocation12]  }
  0x73   : > { %s1469_s11 = scalar_lea.hbm %s1634_s0, %s830_s20  ;;  %s246_s18 = scalar_lea.vmem [#allocation2], %s1391_s15 }
  0x74   : > { %s253_s16 = sshll.u32 %s246_s18, 4  ;;  %s244_s8 = scalar_lea.sflag [#allocation3], %s1391_s15  ;;  %s254_s16 = int_to_ptr.vmem [resolvable:$true] %s253_s16 }
  0x75   : > { %s1067_s23 = scalar_lea.hbm %s1469_s11, 16  ;;  %p1676_p0 = scmp.ne.s32.totalorder %s1672_s4, 0 }
  0x76   : > { %p1068_p9 = scmp.ne.s32.totalorder %s1469_s11, %s1067_s23  ;;  %s1072_s1 = scalar_lea.hbm %s1634_s0, 32 }
  0x77   : > { %p1073_p8 = scmp.lt.u32.totalorder %s1469_s11, %s1634_s0  ;;  %p1074_p7 = scmp.lt.u32.totalorder %s1072_s1, %s1067_s23 }
  0x78   : > { %p1070_p11 = pnand %p1068_p9, %p1676_p0  ;;  %p1076_p3 = scmp.lt.u32.totalorder %s1067_s23, %s1469_s11 }
  0x79   : > { %p1075_p2 = por %p1074_p7, %p1073_p8 }
  0x7a   : > { %p1071_p13 = pneg %p1070_p11 }
  0x7b   : > { %p1077_p5 = por %p1076_p3, %p1075_p2 }
  0x7d   : > { %p1078_p12 = pnand %p1077_p5, %p1071_p13 }
  0x7f   : > { %1081 = shalt.err (!%p1078_p12)
}
  0x80   : > { %s1082_s15 = scalar_lea.vmem %s254_s16, 16  ;;  %s1246_s28 = smov [#allocation2]  }
  0x81   : > { %p1083_p1 = scmp.ne.s32.totalorder %s254_s16, %s1082_s15  ;;  %s1087_s9 = sshll.u32 %s1246_s28, 4  ;;  %s1088_s9 = int_to_ptr.vmem [resolvable:$false] %s1087_s9 }
  0x82   : > { %s1089_s13 = scalar_lea.vmem %s1088_s9, 32  ;;  %p1090_p4 = scmp.lt.s32.totalorder %s254_s16, %s1088_s9 }
  0x83   : > { %p1085_p6 = pnand %p1083_p1, %p1676_p0  ;;  %p1091_p9 = scmp.lt.s32.totalorder %s1089_s13, %s1082_s15 }
  0x85   : > { %p1086_p10 = pneg %p1085_p6  ;;  %p1092_p11 = por %p1091_p9, %p1090_p4 }
  0x87   : > { %p1093_p7 = pnand %p1092_p11, %p1086_p10 }
  0x89   : > { %1096 = shalt.err (!%p1093_p7)
}
  0x8a   : > { %p1677_p8 = scmp.ne.s32.totalorder %s1670_s17, 0  ;;  %s1494_s19 = scalar_lea.hbm %s1636_s2, %s1402_s10 }
  0x8b   : > { %s282_s12 = scalar_lea.vmem [#allocation7], %s1399_s7  ;;  %s1097_s26 = scalar_lea.hbm %s1494_s19, 128 }
  0x8c   : > { %917 = dma.hbm_to_vmem [thread:$0]  (!%p1677_p8), %s1469_s11, 16, %s254_s16, %s244_s8  }
  0x8d   : > { %s289_s1 = sshll.u32 %s282_s12, 4  ;;  %p1098_p13 = scmp.ne.s32.totalorder %s1494_s19, %s1097_s26  ;;  %s290_s1 = int_to_ptr.vmem [resolvable:$true] %s289_s1 }
  0x8e   : > { %s1102_s11 = scalar_lea.hbm %s1636_s2, 256  ;;  %p1103_p5 = scmp.lt.u32.totalorder %s1494_s19, %s1636_s2 }
  0x8f   : > { %p1100_p2 = pnand %p1098_p13, %p1676_p0  ;;  %p1104_p12 = scmp.lt.u32.totalorder %s1102_s11, %s1097_s26 }
  0x90   : > { %p1106_p6 = scmp.lt.u32.totalorder %s1097_s26, %s1494_s19 }
  0x91   : > { %p1101_p3 = pneg %p1100_p2  ;;  %p1105_p1 = por %p1104_p12, %p1103_p5 }
  0x93   : > { %p1107_p10 = por %p1106_p6, %p1105_p1 }
  0x95   : > { %p1108_p4 = pnand %p1107_p10, %p1101_p3 }
  0x97   : > { %1111 = shalt.err (!%p1108_p4)
}
  0x98   : > { %s1112_s28 = scalar_lea.vmem %s290_s1, 128  ;;  %s1247_s9 = smov [#allocation7]  }
  0x99   : > { %p1113_p9 = scmp.ne.s32.totalorder %s290_s1, %s1112_s28  ;;  %s1117_s13 = sshll.u32 %s1247_s9, 4  ;;  %s1118_s13 = int_to_ptr.vmem [resolvable:$false] %s1117_s13 }
  0x9a   : > { %s1119_s18 = scalar_lea.vmem %s1118_s13, 256  ;;  %p1120_p13 = scmp.lt.s32.totalorder %s290_s1, %s1118_s13 }
  0x9b   : > { %p1115_p11 = pnand %p1113_p9, %p1676_p0  ;;  %p1121_p2 = scmp.lt.s32.totalorder %s1119_s18, %s1112_s28 }
  0x9d   : > { %p1116_p7 = pneg %p1115_p11  ;;  %p1122_p8 = por %p1121_p2, %p1120_p13 }
  0x9f   : > { %p1123_p5 = pnand %p1122_p8, %p1116_p7 }
  0xa1   : > { %1126 = shalt.err (!%p1123_p5)
}
  0xa2   : > { %p1678_p12 = scmp.ne.s32.totalorder %s1670_s17, 0  ;;  %s1519_s26 = scalar_lea.hbm %s1637_s3, %s1402_s10 }
  0xa3   : > { %s300_s20 = scalar_lea.vmem [#allocation8], %s1399_s7  ;;  %s1679_s11 = sand.u32 1, %s1239_s24  }
  0xa4   : > { %923 = dma.hbm_to_vmem [thread:$0]  (!%p1678_p12), %s1494_s19, 128, %s290_s1, %s1415_s30  }
  0xa5   : > { %s307_s15 = sshll.u32 %s300_s20, 4  ;;  %s297_s16 = scalar_lea.sflag [#allocation9], %s1679_s11  ;;  %s308_s15 = int_to_ptr.vmem [resolvable:$true] %s307_s15 }
  0xa6   : > { %s1127_s8 = scalar_lea.hbm %s1519_s26, 128  ;;  %s1132_s1 = scalar_lea.hbm %s1637_s3, 256 }
  0xa7   : > { %p1128_p8 = scmp.ne.s32.totalorder %s1519_s26, %s1127_s8  ;;  %p1133_p6 = scmp.lt.u32.totalorder %s1519_s26, %s1637_s3 }
  0xa8   : > { %p1134_p10 = scmp.lt.u32.totalorder %s1132_s1, %s1127_s8  ;;  %p1136_p9 = scmp.lt.u32.totalorder %s1127_s8, %s1519_s26 }
  0xa9   : > { %p1130_p3 = pnand %p1128_p8, %p1676_p0 }
  0xaa   : > { %p1135_p4 = por %p1134_p10, %p1133_p6 }
  0xab   : > { %p1131_p1 = pneg %p1130_p3 }
  0xac   : > { %p1137_p11 = por %p1136_p9, %p1135_p4 }
  0xae   : > { %p1138_p7 = pnand %p1137_p11, %p1131_p1 }
  0xb0   : > { %1141 = shalt.err (!%p1138_p7)
}
  0xb1   : > { %s1142_s7 = scalar_lea.vmem %s308_s15, 128  ;;  %s1248_s9 = smov [#allocation8]  }
  0xb2   : > { %p1143_p13 = scmp.ne.s32.totalorder %s308_s15, %s1142_s7  ;;  %s1147_s13 = sshll.u32 %s1248_s9, 4  ;;  %s1148_s13 = int_to_ptr.vmem [resolvable:$false] %s1147_s13 }
  0xb3   : > { %s1149_s18 = scalar_lea.vmem %s1148_s13, 256  ;;  %p1150_p8 = scmp.lt.s32.totalorder %s308_s15, %s1148_s13 }
  0xb4   : > { %p1145_p2 = pnand %p1143_p13, %p1676_p0  ;;  %p1151_p3 = scmp.lt.s32.totalorder %s1149_s18, %s1142_s7 }
  0xb6   : > { %p1146_p5 = pneg %p1145_p2  ;;  %p1152_p12 = por %p1151_p3, %p1150_p8 }
  0xb8   : > { %p1153_p6 = pnand %p1152_p12, %p1146_p5 }
  0xba   : > { %1156 = shalt.err (!%p1153_p6)
}
  0xbb   : > { %p1680_p10 = scmp.ne.s32.totalorder %s1670_s17, 0  ;;  %p1681_p1 = scmp.ne.s32.totalorder %s1663_s29, 0 }
  0xbc   : > { %s1544_s4 = sand.u32 (!%p1681_p1), 1, %s1231_s22   ;;  %p1682_p0 = scmp.ne.s32.totalorder (!%p1681_p1), %s1660_s27, 0 }
  0xbd   : > { %926 = dma.hbm_to_vmem [thread:$0]  (!%p1680_p10), %s1519_s26, 128, %s308_s15, %s297_s16  }
  0xbe   : > { %316 = sbr.rel (%p1681_p1) target bundleno = 1185 (0x4a1), region = 44  ;;  %s319_s23 = scalar_lea.sflag (!%p1681_p1), [#allocation3], %s1544_s4 }
  0xbf   : > { %s321_s12 = scalar_lea.vmem (!%p1681_p1), [#allocation2], %s1544_s4 }
  0xc5   : > { %1202 = dma.done.wait (%p1682_p0), %s319_s23, 16  }
  0xc6   : > { %1204 = vsyncadd (%p1682_p0), %s319_s23, 4294967280  ;;  %s326_s17 = sand.u32 1, %s1310_s25   ;;  %s1554_s26 = sshll.u32 %s1544_s4, 3 }
  0xc7   : > { %s327_s29 = scalar_lea.sflag [#allocation6], %s326_s17  ;;  %s330_s20 = scalar_lea.vmem [#allocation5], %s1554_s26 }
  0xc8   : > { %1206 = dma.done.wait (%p1682_p0), %s327_s29, 256  }
  0xc9   : > { %1208 = vsyncadd (%p1682_p0), %s327_s29, 4294967040  ;;  %s339_s15 = scalar_lea.vmem [#allocation7], %s1554_s26  ;;  %s345_s11 = scalar_lea.sflag [#allocation9], %s326_s17 }
  0xca   : > { %s348_s16 = scalar_lea.vmem [#allocation8], %s1554_s26 }
  0xcb   : > { %1210 = dma.done.wait (%p1682_p0), %s345_s11, 128  }
  0xcc   : > { %1212 = vsyncadd (%p1682_p0), %s345_s11, 4294967168  ;;  %p1683_p12 = scmp.eq.s32.totalorder %s1310_s25, 0 }
  0xce   : > { %1214 = dma.done.wait (%p1683_p12), [#allocation9], 512   ;;  %p1684_p4 = pmov %p1683_p12 }
  0xd0   : > { %1216 = vsyncadd (%p1684_p4), [#allocation9], 4294966784  ;;  %p1685_p9 = pmov %p1684_p4 }
  0xd1   : > { %p1686_p11 = pmov %p1684_p4 }
  0xd2   : > { %1218 = dma.done.wait (%p1685_p9), [#allocation12], 16  }
  0xd3   : > { %1220 = vsyncadd (%p1686_p11), [#allocation12], 4294967280  ;;  %v1249_v0 = vmov 0.0   ;;  %vm1250_vm0 = vmmov 0   ;;  %vm404_vm1 = vcmask 261120   ;;  %v400_v1 = vld [vmem:[%s339_s15] sm:$0xff]  ;;  %v483_v3 = vlaneseq }
  0xd4   : > { %862 = vmatprep.subr.mxu0 %v1249_v0  ;;  %864 = vmatprep.mubr.msk.f32.mxu0 %vm1250_vm0, %v1249_v0  ;;  %v399_v2 = vld [vmem:[%s330_s20] sm:$0xff]  ;;  %v402_v4 = vld [vmem:[%s321_s12] sm:$0x1]  ;;  %v1251_v7 = vmov 0   ;;  %vm489_vm4 = vcmask 64512   ;;  %v574_v21 = vld [vmem:[#allocation10] sm:$0xff] }
  0xd5   : > { %880 = vmatprep.mubr.msk.f32.mxu1 %vm1250_vm0, %v1249_v0  ;;  %863 = vmatpush3.xpose.msk.msra.mxu0 %vm404_vm1, %v400_v1  ;;  %v484_v5 = vshrl.u32 %v483_v3, 7  ;;  %vm403_vm2 = vcmp.eq.s32.totalorder %v402_v4, 0  ;;  %v401_v20 = vld [vmem:[%s348_s16] sm:$0xff]  ;;  %v575_v22 = vld [vmem:[#allocation10 + $0x8] sm:$0xff]  ;;  %v1252_v24 = vmov 0.0|0.0   ;;  %s850_s27 = sshll.u32 %s1310_s25, 7 }
  0xd6   : > { %867 = vmatprep.subr.mxu0 %v1249_v0  ;;  %v482_v8 = vsel %vm403_vm2, 1, %v1251_v7  ;;  %v576_v23 = vld [vmem:[#allocation10 + $0x10] sm:$0xff]  ;;  %883 = vmatprep.subr.bf16.mxu1 %v1252_v24  ;;  %v884_v25 = vpack.c.bf16 %v575_v22, %v574_v21  ;;  %v577_v26 = vld [vmem:[#allocation10 + $0x18] sm:$0xff]  ;;  %v847_v33 = vld [vmem:[#allocation11] ss:$0 sm:$0xff]  ;;  %s398_s8 = scalar_lea.vmem [#allocation13], %s1554_s26  ;;  %s1590_s10 = scalar_lea.hbm %s1640_s6, %s850_s27 }
  0xd7   : > { %v485_v6 = vsub.s32 0, %v484_v5  ;;  %v887_v27 = vpack.c.bf16 %v577_v26, %v576_v23  ;;  %s673_s30 = sshll.u32 %s398_s8, 4  ;;  %s660_s28 = scalar_lea.sflag [#allocation4], %s1544_s4  ;;  %s1592_s30 = int_to_ptr.vmem [resolvable:$true] %s673_s30 }
  0xd8   : > { %865 = vmatmul.mubr.msk.f32.vlgmr.msra.gmra.mrb[0].mxu0 %vm404_vm1, %v399_v2  ;;  %885 = vmatpush3.bf16.msra.mxu1 %v884_v25  ;;  %s1157_s7 = scalar_lea.vmem %s1592_s30, 128  ;;  %p1687_p13 = scmp.ne.s32.totalorder %s1669_s14, 0 }
  0xd9   : > { %869 = vmatprep.mubr.msk.f32.mxu0 %vm1250_vm0, %v1249_v0  ;;  %v486_v9 = vrot.slane %v482_v8, %v485_v6  ;;  %868 = vmatpush3.msra.mxu0 %v401_v20  ;;  %p1158_p7 = scmp.ne.s32.totalorder %s1592_s30, %s1157_s7  ;;  %s1253_s25 = smov [#allocation13]  }
  0xda   : > { %886 = vmatprep.subr.bf16.mxu1 %v1252_v24  ;;  %s1161_s9 = sshll.u32 %s1253_s25, 4  ;;  %s1162_s9 = int_to_ptr.vmem [resolvable:$false] %s1161_s9 }
  0xdb   : > { %vm487_vm3 = vcmp.eq.s32.totalorder %v486_v9, 1  ;;  %p1159_p2 = pnand %p1158_p7, %p1687_p13  ;;  %s1163_s13 = scalar_lea.vmem %s1162_s9, 256 }
  0xdc   : > { %888 = vmatpush3.bf16.msra.mxu1 %v887_v27  ;;  %p1164_p8 = scmp.lt.s32.totalorder %s1592_s30, %s1162_s9  ;;  %p1165_p3 = scmp.lt.s32.totalorder %s1163_s13, %s1157_s7 }
  0xdd   : > { %p1160_p5 = pneg %p1159_p2 }
  0xde   : > { %p1166_p6 = por %p1165_p3, %p1164_p8 }
  0xe0   : > { %p1167_p10 = pnand %p1166_p6, %p1160_p5 }
 0x1ab   : > { %v477_v10 = vpop.f32.mrb[0].mxu0 }
 0x1ac   : > { %v481_v11 = vmul.f32 0.17677669, %v477_v10  ;;  %v866_v12 = vpop.f32.mrb[1].mxu0 }
 0x1ae   : > { %v488_v13 = vsel %vm487_vm3, -1e+09, %v481_v11 }
 0x1af   : > { %v490_v14 = vsel %vm489_vm4, %v488_v13, -inf }
 0x1b0   : > { %491 = vmax.xlane.f32.xlu0 %v490_v14 }
 0x23d   : > { %v492_v15 = vpop.xlane.xlu0 %491 }
 0x23e   : > { %v493_v16 = vsub.f32 %v488_v13, %v492_v15 }
 0x240   : > { %v494_v17 = vmul.f32 1.442695, %v493_v16 }
 0x242   : > { %977 = vpow2.f32 %v494_v17 }
 0x24c   : > { %v978_v18 = vpop.eup %977 }
 0x24d   : > { %v496_v19 = vsel %vm489_vm4, %v978_v18, 0.0 }
 0x24e   : > { %497 = vadd.xlane.f32.xlu0 %v496_v19 }
 0x2db   : > { %v498_v28 = vpop.xlane.xlu0 %497 }
 0x2dc   : > { %979 = vrcp.f32 %v498_v28 }
 0x2e6   : > { %v980_v29 = vpop.eup %979 }
 0x2e7   : > { %v500_v30 = vmul.f32 %v980_v29, %v978_v18 }
 0x2e9   : > { %870 = vmatmul.mubr.msk.f32.vlgmr.msra.gmra.mrb[2].mxu0 %vm489_vm4, %v500_v30 }
 0x3bc   : > { %v570_v31 = vpop.f32.mrb[2].mxu0 }
 0x3bd   : > { %v871_v32 = vpop.f32.mrb[3].mxu0  ;;  %881 = vmatmul.mubr.msk.f32.vlgmr.msra.gmra.mrb[0].mxu1 %vm404_vm1, %v570_v31 }
 0x490   : > { %v654_v34 = vpop.f32.mrb[0].mxu1 }
 0x491   : > { %v655_v35 = vadd.f32 %v847_v33, %v654_v34  ;;  %v882_v36 = vpop.f32.mrb[1].mxu1 }
 0x493   : > { %658 = vst [vmem:[%s398_s8] sm:$0xff] %v655_v35 }
 0x494   : > { %1170 = shalt.err (!%p1167_p10)
}
 0x495   : > { %s1171_s18 = scalar_lea.hbm %s1590_s10, 128  ;;  %s1175_s12 = scalar_lea.hbm %s1640_s6, 256 }
 0x496   : > { %p1172_p1 = scmp.ne.s32.totalorder %s1590_s10, %s1171_s18  ;;  %p1176_p4 = scmp.lt.u32.totalorder %s1590_s10, %s1640_s6 }
 0x497   : > { %p1177_p9 = scmp.lt.u32.totalorder %s1175_s12, %s1171_s18  ;;  %p1179_p7 = scmp.lt.u32.totalorder %s1171_s18, %s1590_s10 }
 0x498   : > { %p1173_p0 = pnand %p1172_p1, %p1687_p13 }
 0x499   : > { %p1178_p11 = por %p1177_p9, %p1176_p4 }
 0x49a   : > { %p1174_p12 = pneg %p1173_p0 }
 0x49b   : > { %p1180_p2 = por %p1179_p7, %p1178_p11 }
 0x49d   : > { %p1181_p5 = pnand %p1180_p2, %p1174_p12 }
 0x49f   : > { %1184 = shalt.err (!%p1181_p5)
}
 0x4a0   : > { %905 = dma.vmem_to_hbm [thread:$0]  (%p1687_p13), %s1592_s30, 128, %s1590_s10, %s660_s28  }
 0x4a1 PF: > { %s1688_s29 = sld [smem:[#allocation21_spill]]  ;;  %s685_s20 = sand.u32 1, %s1227_s21  }
 0x4a2   : > { %p1690_p3 = scmp.ge.s32.totalorder %s1239_s24, 2  ;;  %s686_s15 = scalar_lea.sflag [#allocation4], %s685_s20 }
 0x4a7   : > { %p1689_p8 = scmp.ne.s32.totalorder %s1688_s29, 0 }
 0x4a9   : > { %p928_p6 = pnand %p1690_p3, %p1689_p8 }
 0x4ab   : > { %1222 = dma.done.wait (!%p928_p6), %s686_s15, 128  }
 0x4ac   : > { %1224 = vsyncadd (!%p928_p6), %s686_s15, 4294967168  ;;  %s1691_s24 = sld [smem:[#allocation22_spill]]  ;;  %s1692_s11 = sld [smem:[#allocation20_spill]] }
 0x4ad   : > { %s1693_s23 = sld [smem:[#allocation23_spill]]  ;;  %s1694_s21 = smov %s1231_s22 }
 0x4b2   : > { %p26_p10 = scmp.ge.s32.totalorder %s1691_s24, 4   ;;  %s1695_s22 = smov %s1692_s11 }
 0x4b4   :  { %28 = sbr.rel (!%p26_p10) target bundleno = 13 (0xd), region = 134 }
 0x4bb   :  { %691 = vsyncpa [#allocation3], 1 }
 0x4bc   :  { %693 = vsyncpa [#allocation3 + $0x1], 1 }
 0x4bd   :  { %694 = vsyncpa [#allocation6], 1 }
 0x4be   :  { %696 = vsyncpa [#allocation6 + $0x1], 1 }
 0x4bf   :  { %697 = vsyncpa [#allocation9], 1 }
 0x4c0   :  { %699 = vsyncpa [#allocation9 + $0x1], 1 }
 0x4c1   :  { %700 = vsyncpa [#allocation12], 1 }
 0x4c2   :  { %701 = vsyncpa [#allocation4], 1 }
 0x4c3   :  { %703 = vsyncpa [#allocation4 + $0x1], 1 }

// kernel: bert_model_forward.9
= control target key start
LH: loop header
LB: loop body
LE: loop exit
PB: predicated region body
PF: predicated region fallthrough
CT: control target
= control target key end

     0   :  { %s3266_s0 = inlined_call_operand.hbm [shape: s32[4,1,8], index: 0, kind: input, shape index: {}]   ;;  %s3267_s1 = inlined_call_operand.hbm [shape: f32[4,8,32], index: 1, kind: input, shape index: {}]   ;;  %s3268_s2 = inlined_call_operand.hbm [shape: f32[32,96], index: 2, kind: input, shape index: {}]   ;;  %s3269_s3 = inlined_call_operand.hbm [shape: f32[1,96], index: 3, kind: input, shape index: {}]   ;;  %s3270_s4 = inlined_call_operand.hbm [shape: f32[32,32], index: 4, kind: input, shape index: {}]   ;;  %s3271_s5 = inlined_call_operand.hbm [shape: f32[1,32], index: 5, kind: input, shape index: {}]   ;;  %s3272_s6 = inlined_call_operand.hbm [shape: f32[1,32], index: 6, kind: input, shape index: {}]   ;;  %s3273_s7 = inlined_call_operand.hbm [shape: f32[1,32], index: 7, kind: input, shape index: {}]   ;;  %s3274_s8 = inlined_call_operand.hbm [shape: f32[32,64], index: 8, kind: input, shape index: {}]   ;;  %s3275_s9 = inlined_call_operand.hbm [shape: f32[1,64], index: 9, kind: input, shape index: {}]   ;;  %s3276_s10 = inlined_call_operand.hbm [shape: f32[64,32], index: 10, kind: input, shape index: {}]   ;;  %s3277_s11 = inlined_call_operand.hbm [shape: f32[1,32], index: 11, kind: input, shape index: {}]   ;;  %s3278_s12 = inlined_call_operand.hbm [shape: f32[1,32], index: 12, kind: input, shape index: {}]   ;;  %s3279_s13 = inlined_call_operand.hbm [shape: f32[1,32], index: 13, kind: input, shape index: {}]   ;;  %s3280_s14 = inlined_call_operand.hbm [shape: f32[4,8,32], index: 14, kind: output, shape index: {}]  }
   0x1   :  { %3294 = sst [smem:[#allocation40_spill]] %s3266_s0 }
   0x2   :  { %3295 = sst [smem:[#allocation41_spill]] %s3267_s1 }
   0x3   :  { %3296 = sst [smem:[#allocation42_spill]] %s3268_s2 }
   0x4   :  { %3297 = sst [smem:[#allocation43_spill]] %s3269_s3 }
   0x5   :  { %3298 = sst [smem:[#allocation44_spill]] %s3270_s4 }
   0x6   :  { %3299 = sst [smem:[#allocation45_spill]] %s3271_s5 }
   0x7   :  { %3300 = sst [smem:[#allocation46_spill]] %s3272_s6 }
   0x8   :  { %3301 = sst [smem:[#allocation47_spill]] %s3273_s7 }
   0x9   :  { %3302 = sst [smem:[#allocation48_spill]] %s3280_s14 }
   0xa   :  { %19 = vsyncpa [#allocation4], 0 }
   0xb   :  { %21 = vsyncpa [#allocation4 + $0x1], 0 }
   0xc   :  { %22 = vsyncpa [#allocation7], 0 }
   0xd   :  { %24 = vsyncpa [#allocation7 + $0x1], 0 }
   0xe   :  { %25 = vsyncpa [#allocation10], 0 }
   0xf   :  { %26 = vsyncpa [#allocation13], 0 }
  0x10   :  { %27 = vsyncpa [#allocation16], 0 }
  0x11   :  { %28 = vsyncpa [#allocation19], 0 }
  0x12   :  { %29 = vsyncpa [#allocation22], 0 }
  0x13   :  { %30 = vsyncpa [#allocation25], 0 }
  0x14   :  { %31 = vsyncpa [#allocation5], 0 }
  0x15   :  { %33 = vsyncpa [#allocation5 + $0x1], 0  ;;  %s2705_s29 = smov 0   ;;  %s2707_s30 = smov 0  }
  0x16   :  { %s2709_s15 = smov 0   ;;  %s2711_s16 = smov 0  }
  0x17 LB: > { %3303 = sst [smem:[#allocation37_spill]] %s2590_s29  ;;  %s2604_s17 = smov [#allocation8]   ;;  %s2602_s16 = sphi %s2711_s16, %s3352_s16   ;;  %s2598_s15 = sphi %s2709_s15, %s3351_s15   ;;  %s2594_s30 = sphi %s2707_s30, %s3350_s30   ;;  %s2590_s29 = sphi %s2705_s29, %s3349_s29  }
  0x18   : > { %s386_s18 = sshll.u32 %s2604_s17, 4  ;;  %s2726_s19 = sadd.s32 4294967295, %s2602_s16   ;;  %s2731_s18 = int_to_ptr.vmem [resolvable:$true] %s386_s18 }
  0x19   : > { %3304 = sst [smem:[#allocation38_spill]] %s2726_s19  ;;  %p1720_p0 = scmp.ge.s32.totalorder %s2602_s16, 1 }
  0x1a   : > { %p3290_p1 = scmp.eq.s32.totalorder %s2726_s19, 0  ;;  %p374_p2 = scmp.lt.s32.totalorder %s2602_s16, 5 }
  0x1b   : > { %s2605_s21 = smov [#allocation9]   ;;  %s2606_s24 = smov [#allocation12]  }
  0x1c   : > { %p2733_p3 = pnand %p1720_p0, %p374_p2  ;;  %s400_s22 = sshll.u32 %s2605_s21, 4  ;;  %s2745_s22 = int_to_ptr.vmem [resolvable:$true] %s400_s22 }
  0x1d   : > { %s424_s25 = sshll.u32 %s2606_s24, 4  ;;  %s3308_s2 = sld [smem:[#allocation42_spill]]  ;;  %s2747_s25 = int_to_ptr.vmem [resolvable:$true] %s424_s25 }
  0x1e   : > { %s3305_s20 = scalar_select %p2733_p3, 1, 0 }
  0x1f   : > { %p1967_p4 = pneg %p2733_p3 }
  0x20   : > { %3306 = sst [smem:[#allocation39_spill]] %s3305_s20 }
  0x21   : > { %p2741_p5 = pnand %p1967_p4, %p3290_p1 }
  0x23   : > { %s2108_s28 = scalar_lea.hbm %s3308_s2, 512  ;;  %p2757_p7 = pneg %p2741_p5 }
  0x24   : > { %p2109_p6 = scmp.ne.s32.totalorder %s3308_s2, %s2108_s28  ;;  %p2115_p10 = scmp.lt.u32.totalorder %s2108_s28, %s3308_s2 }
  0x26   : > { %p2111_p8 = pnand %p2757_p7, %p2109_p6 }
  0x28   : > { %p2112_p9 = pneg %p2111_p8 }
  0x2a   : > { %p2117_p11 = pnand %p2115_p10, %p2112_p9 }
  0x2c   : > { %2120 = shalt.err (!%p2117_p11)
}
  0x2d   : > { %s2121_s14 = scalar_lea.vmem %s2731_s18, 512  ;;  %p2129_p2 = scmp.lt.s32.totalorder %s2731_s18, %s2731_s18 }
  0x2e   : > { %p2122_p12 = scmp.ne.s32.totalorder %s2731_s18, %s2121_s14  ;;  %p2130_p4 = scmp.lt.s32.totalorder %s2121_s14, %s2121_s14 }
  0x30   : > { %p2124_p13 = pnand %p2122_p12, %p2757_p7  ;;  %p2131_p6 = por %p2130_p4, %p2129_p2 }
  0x32   : > { %p2125_p0 = pneg %p2124_p13 }
  0x34   : > { %p2132_p8 = pnand %p2131_p6, %p2125_p0 }
  0x36   : > { %2135 = shalt.err (!%p2132_p8)
}
  0x37   : > { %s3288_s26 = smov 128   ;;  %s2608_s20 = smov 8  }
  0x38   : > { %1970 = dma.hbm_to_vmem [thread:$0]  (!%p2741_p5), %s3308_s2, 512, %s2731_s18, [#allocation7], %s3288_s26, %s3288_s26, %s2608_s20  }
  0x39   : > { %s3310_s3 = sld [smem:[#allocation43_spill]] }
  0x3f   : > { %s2136_s14 = scalar_lea.hbm %s3310_s3, 16 }
  0x40   : > { %p2137_p9 = scmp.ne.s32.totalorder %s3310_s3, %s2136_s14  ;;  %p2143_p12 = scmp.lt.u32.totalorder %s2136_s14, %s3310_s3 }
  0x42   : > { %p2139_p10 = pnand %p2137_p9, %p2757_p7 }
  0x44   : > { %p2140_p11 = pneg %p2139_p10 }
  0x46   : > { %p2145_p13 = pnand %p2143_p12, %p2140_p11 }
  0x48   : > { %2148 = shalt.err (!%p2145_p13)
}
  0x49   : > { %s2149_s18 = scalar_lea.vmem %s2745_s22, 16  ;;  %s2156_s0 = scalar_lea.vmem %s2745_s22, 32 }
  0x4a   : > { %p2150_p0 = scmp.ne.s32.totalorder %s2745_s22, %s2149_s18  ;;  %p2157_p6 = scmp.lt.s32.totalorder %s2745_s22, %s2745_s22 }
  0x4b   : > { %p2158_p8 = scmp.lt.s32.totalorder %s2156_s0, %s2149_s18 }
  0x4c   : > { %p2152_p2 = pnand %p2150_p0, %p2757_p7 }
  0x4d   : > { %p2159_p9 = por %p2158_p8, %p2157_p6 }
  0x4e   : > { %p2153_p4 = pneg %p2152_p2 }
  0x50   : > { %p2160_p10 = pnand %p2159_p9, %p2153_p4 }
  0x52   : > { %2163 = shalt.err (!%p2160_p10)
}
  0x53   : > { %1973 = dma.hbm_to_vmem [thread:$0]  (!%p2741_p5), %s3310_s3, 16, %s2745_s22, [#allocation10]  }
  0x54   : > { %s3311_s5 = sld [smem:[#allocation45_spill]] }
  0x5a   : > { %s2164_s28 = scalar_lea.hbm %s3311_s5, 16 }
  0x5b   : > { %p2165_p11 = scmp.ne.s32.totalorder %s3311_s5, %s2164_s28  ;;  %p2171_p0 = scmp.lt.u32.totalorder %s2164_s28, %s3311_s5 }
  0x5d   : > { %p2167_p12 = pnand %p2165_p11, %p2757_p7 }
  0x5f   : > { %p2168_p13 = pneg %p2167_p12 }
  0x61   : > { %p2173_p2 = pnand %p2171_p0, %p2168_p13 }
  0x63   : > { %2176 = shalt.err (!%p2173_p2)
}
  0x64   : > { %s2177_s22 = scalar_lea.vmem %s2747_s25, 16  ;;  %s2184_s0 = scalar_lea.vmem %s2747_s25, 32 }
  0x65   : > { %p2178_p4 = scmp.ne.s32.totalorder %s2747_s25, %s2177_s22  ;;  %p2185_p9 = scmp.lt.s32.totalorder %s2747_s25, %s2747_s25 }
  0x66   : > { %p2186_p10 = scmp.lt.s32.totalorder %s2184_s0, %s2177_s22 }
  0x67   : > { %p2180_p6 = pnand %p2178_p4, %p2757_p7 }
  0x68   : > { %p2187_p11 = por %p2186_p10, %p2185_p9 }
  0x69   : > { %p2181_p8 = pneg %p2180_p6 }
  0x6b   : > { %p2188_p12 = pnand %p2187_p11, %p2181_p8 }
  0x6d   : > { %2191 = shalt.err (!%p2188_p12)
}
  0x6e   : > { %1979 = dma.hbm_to_vmem [thread:$0]  (!%p2741_p5), %s3311_s5, 16, %s2747_s25, [#allocation13]  }
  0x6f   : > { %s2609_s19 = smov [#allocation15]   ;;  %s2610_s28 = smov [#allocation18]  }
  0x70   : > { %s446_s27 = sshll.u32 %s2609_s19, 4  ;;  %s470_s17 = sshll.u32 %s2610_s28, 4  ;;  %s447_s27 = int_to_ptr.vmem [resolvable:$true] %s446_s27  ;;  %s471_s17 = int_to_ptr.vmem [resolvable:$true] %s470_s17 }
  0x71   : > { %s3312_s7 = sld [smem:[#allocation47_spill]] }
  0x77   : > { %s2192_s18 = scalar_lea.hbm %s3312_s7, 16 }
  0x78   : > { %p2193_p13 = scmp.ne.s32.totalorder %s3312_s7, %s2192_s18  ;;  %p2199_p4 = scmp.lt.u32.totalorder %s2192_s18, %s3312_s7 }
  0x7a   : > { %p2195_p0 = pnand %p2193_p13, %p2757_p7 }
  0x7c   : > { %p2196_p2 = pneg %p2195_p0 }
  0x7e   : > { %p2201_p6 = pnand %p2199_p4, %p2196_p2 }
  0x80   : > { %2204 = shalt.err (!%p2201_p6)
}
  0x81   : > { %s2205_s25 = scalar_lea.vmem %s447_s27, 16  ;;  %s2212_s29 = scalar_lea.vmem %s447_s27, 32 }
  0x82   : > { %p2206_p8 = scmp.ne.s32.totalorder %s447_s27, %s2205_s25  ;;  %p2213_p11 = scmp.lt.s32.totalorder %s447_s27, %s447_s27 }
  0x83   : > { %p2214_p12 = scmp.lt.s32.totalorder %s2212_s29, %s2205_s25 }
  0x84   : > { %p2208_p9 = pnand %p2206_p8, %p2757_p7 }
  0x85   : > { %p2215_p1 = por %p2214_p12, %p2213_p11 }
  0x86   : > { %p2209_p10 = pneg %p2208_p9 }
  0x88   : > { %p2216_p3 = pnand %p2215_p1, %p2209_p10 }
  0x8a   : > { %2219 = shalt.err (!%p2216_p3)
}
  0x8b   : > { %1985 = dma.hbm_to_vmem [thread:$0]  (!%p2741_p5), %s3312_s7, 16, %s447_s27, [#allocation16]  }
  0x8c   : > { %s2220_s14 = scalar_lea.hbm %s3275_s9, 16 }
  0x8d   : > { %p2221_p13 = scmp.ne.s32.totalorder %s3275_s9, %s2220_s14  ;;  %p2227_p3 = scmp.lt.u32.totalorder %s2220_s14, %s3275_s9 }
  0x8f   : > { %p2223_p0 = pnand %p2221_p13, %p2757_p7 }
  0x91   : > { %p2224_p1 = pneg %p2223_p0 }
  0x93   : > { %p2229_p2 = pnand %p2227_p3, %p2224_p1 }
  0x95   : > { %2232 = shalt.err (!%p2229_p2)
}
  0x96   : > { %s2233_s25 = scalar_lea.vmem %s471_s17, 16  ;;  %s2240_s27 = scalar_lea.vmem %s471_s17, 32 }
  0x97   : > { %p2234_p4 = scmp.ne.s32.totalorder %s471_s17, %s2233_s25  ;;  %p2241_p9 = scmp.lt.s32.totalorder %s471_s17, %s471_s17 }
  0x98   : > { %p2242_p10 = scmp.lt.s32.totalorder %s2240_s27, %s2233_s25 }
  0x99   : > { %p2236_p6 = pnand %p2234_p4, %p2757_p7 }
  0x9a   : > { %p2243_p11 = por %p2242_p10, %p2241_p9 }
  0x9b   : > { %p2237_p8 = pneg %p2236_p6 }
  0x9d   : > { %p2244_p12 = pnand %p2243_p11, %p2237_p8 }
  0x9f   : > { %2247 = shalt.err (!%p2244_p12)
}
  0xa0   : > { %1991 = dma.hbm_to_vmem [thread:$0]  (!%p2741_p5), %s3275_s9, 16, %s471_s17, [#allocation19]  }
  0xa1   : > { %s2611_s28 = smov [#allocation21]   ;;  %s2612_s24 = smov [#allocation11]  }
  0xa2   : > { %s494_s26 = sshll.u32 %s2611_s28, 4  ;;  %s410_s14 = sshll.u32 %s2612_s24, 4  ;;  %s495_s26 = int_to_ptr.vmem [resolvable:$true] %s494_s26  ;;  %s411_s14 = int_to_ptr.vmem [resolvable:$true] %s410_s14 }
  0xa3   : > { %s2248_s0 = scalar_lea.hbm %s3277_s11, 16 }
  0xa4   : > { %p2249_p13 = scmp.ne.s32.totalorder %s3277_s11, %s2248_s0  ;;  %p2255_p3 = scmp.lt.u32.totalorder %s2248_s0, %s3277_s11 }
  0xa6   : > { %p2251_p0 = pnand %p2249_p13, %p2757_p7 }
  0xa8   : > { %p2252_p1 = pneg %p2251_p0 }
  0xaa   : > { %p2257_p2 = pnand %p2255_p3, %p2252_p1 }
  0xac   : > { %2260 = shalt.err (!%p2257_p2)
}
  0xad   : > { %s2261_s17 = scalar_lea.vmem %s495_s26, 16  ;;  %s2268_s19 = scalar_lea.vmem %s495_s26, 32 }
  0xae   : > { %p2262_p4 = scmp.ne.s32.totalorder %s495_s26, %s2261_s17  ;;  %p2269_p9 = scmp.lt.s32.totalorder %s495_s26, %s495_s26 }
  0xaf   : > { %p2270_p10 = scmp.lt.s32.totalorder %s2268_s19, %s2261_s17 }
  0xb0   : > { %p2264_p6 = pnand %p2262_p4, %p2757_p7 }
  0xb1   : > { %p2271_p11 = por %p2270_p10, %p2269_p9 }
  0xb2   : > { %p2265_p8 = pneg %p2264_p6 }
  0xb4   : > { %p2272_p12 = pnand %p2271_p11, %p2265_p8 }
  0xb6   : > { %2275 = shalt.err (!%p2272_p12)
}
  0xb7   : > { %1997 = dma.hbm_to_vmem [thread:$0]  (!%p2741_p5), %s3277_s11, 16, %s495_s26, [#allocation22]  }
  0xb8   : > { %s3313_s4 = sld [smem:[#allocation44_spill]] }
  0xbe   : > { %s2276_s0 = scalar_lea.hbm %s3313_s4, 512 }
  0xbf   : > { %p2277_p13 = scmp.ne.s32.totalorder %s3313_s4, %s2276_s0  ;;  %p2283_p3 = scmp.lt.u32.totalorder %s2276_s0, %s3313_s4 }
  0xc1   : > { %p2279_p0 = pnand %p2277_p13, %p2757_p7 }
  0xc3   : > { %p2280_p1 = pneg %p2279_p0 }
  0xc5   : > { %p2285_p2 = pnand %p2283_p3, %p2280_p1 }
  0xc7   : > { %2288 = shalt.err (!%p2285_p2)
}
  0xc8   : > { %s2289_s17 = scalar_lea.vmem %s411_s14, 512  ;;  %p2297_p9 = scmp.lt.s32.totalorder %s411_s14, %s411_s14 }
  0xc9   : > { %p2290_p4 = scmp.ne.s32.totalorder %s411_s14, %s2289_s17  ;;  %p2298_p10 = scmp.lt.s32.totalorder %s2289_s17, %s2289_s17 }
  0xcb   : > { %p2292_p6 = pnand %p2290_p4, %p2757_p7  ;;  %p2299_p11 = por %p2298_p10, %p2297_p9 }
  0xcd   : > { %p2293_p8 = pneg %p2292_p6 }
  0xcf   : > { %p2300_p12 = pnand %p2299_p11, %p2293_p8 }
  0xd1   : > { %2303 = shalt.err (!%p2300_p12)
}
  0xd2   : > { %s3314_s26 = smov 128   ;;  %s2613_s24 = smov [#allocation14]  }
  0xd3   : > { %1976 = dma.hbm_to_vmem [thread:$0]  (!%p2741_p5), %s3313_s4, 512, %s411_s14, [#allocation10], %s3314_s26, %s3314_s26, %s2608_s20  }
  0xd4   : > { %s435_s18 = sshll.u32 %s2613_s24, 4  ;;  %s2614_s22 = smov [#allocation17]   ;;  %s436_s18 = int_to_ptr.vmem [resolvable:$true] %s435_s18 }
  0xd5   : > { %s456_s0 = sshll.u32 %s2614_s22, 4  ;;  %s3315_s6 = sld [smem:[#allocation46_spill]]  ;;  %s457_s0 = int_to_ptr.vmem [resolvable:$true] %s456_s0 }
  0xdb   : > { %s2304_s27 = scalar_lea.hbm %s3315_s6, 16 }
  0xdc   : > { %p2305_p13 = scmp.ne.s32.totalorder %s3315_s6, %s2304_s27  ;;  %p2311_p3 = scmp.lt.u32.totalorder %s2304_s27, %s3315_s6 }
  0xde   : > { %p2307_p0 = pnand %p2305_p13, %p2757_p7 }
  0xe0   : > { %p2308_p1 = pneg %p2307_p0 }
  0xe2   : > { %p2313_p2 = pnand %p2311_p3, %p2308_p1 }
  0xe4   : > { %2316 = shalt.err (!%p2313_p2)
}
  0xe5   : > { %s2317_s14 = scalar_lea.vmem %s436_s18, 16  ;;  %s2324_s28 = scalar_lea.vmem %s436_s18, 32 }
  0xe6   : > { %p2318_p4 = scmp.ne.s32.totalorder %s436_s18, %s2317_s14  ;;  %p2325_p9 = scmp.lt.s32.totalorder %s436_s18, %s436_s18 }
  0xe7   : > { %p2326_p10 = scmp.lt.s32.totalorder %s2324_s28, %s2317_s14 }
  0xe8   : > { %p2320_p6 = pnand %p2318_p4, %p2757_p7 }
  0xe9   : > { %p2327_p11 = por %p2326_p10, %p2325_p9 }
  0xea   : > { %p2321_p8 = pneg %p2320_p6 }
  0xec   : > { %p2328_p12 = pnand %p2327_p11, %p2321_p8 }
  0xee   : > { %2331 = shalt.err (!%p2328_p12)
}
  0xef   : > { %1982 = dma.hbm_to_vmem [thread:$0]  (!%p2741_p5), %s3315_s6, 16, %s436_s18, [#allocation13]  }
  0xf0   : > { %s2332_s25 = scalar_lea.hbm %s3274_s8, 512 }
  0xf1   : > { %p2333_p13 = scmp.ne.s32.totalorder %s3274_s8, %s2332_s25  ;;  %p2339_p3 = scmp.lt.u32.totalorder %s2332_s25, %s3274_s8 }
  0xf3   : > { %p2335_p0 = pnand %p2333_p13, %p2757_p7 }
  0xf5   : > { %p2336_p1 = pneg %p2335_p0 }
  0xf7   : > { %p2341_p2 = pnand %p2339_p3, %p2336_p1 }
  0xf9   : > { %2344 = shalt.err (!%p2341_p2)
}
  0xfa   : > { %s2345_s14 = scalar_lea.vmem %s457_s0, 512  ;;  %p2353_p9 = scmp.lt.s32.totalorder %s457_s0, %s457_s0 }
  0xfb   : > { %p2346_p4 = scmp.ne.s32.totalorder %s457_s0, %s2345_s14  ;;  %p2354_p10 = scmp.lt.s32.totalorder %s2345_s14, %s2345_s14 }
  0xfd   : > { %p2348_p6 = pnand %p2346_p4, %p2757_p7  ;;  %p2355_p11 = por %p2354_p10, %p2353_p9 }
  0xff   : > { %p2349_p8 = pneg %p2348_p6 }
 0x101   : > { %p2356_p12 = pnand %p2355_p11, %p2349_p8 }
 0x103   : > { %2359 = shalt.err (!%p2356_p12)
}
 0x104   : > { %1988 = dma.hbm_to_vmem [thread:$0]  (!%p2741_p5), %s3274_s8, 512, %s457_s0, [#allocation16], %s3314_s26, %s3314_s26, %s2608_s20  }
 0x105   : > { %s2615_s24 = smov [#allocation20]   ;;  %s2616_s2 = smov [#allocation23]  }
 0x106   : > { %s480_s22 = sshll.u32 %s2615_s24, 4  ;;  %s505_s1 = sshll.u32 %s2616_s2, 4  ;;  %s481_s22 = int_to_ptr.vmem [resolvable:$true] %s480_s22  ;;  %s506_s1 = int_to_ptr.vmem [resolvable:$true] %s505_s1 }
 0x107   : > { %s2360_s29 = scalar_lea.hbm %s3276_s10, 1024 }
 0x108   : > { %p2361_p13 = scmp.ne.s32.totalorder %s3276_s10, %s2360_s29  ;;  %p2367_p3 = scmp.lt.u32.totalorder %s2360_s29, %s3276_s10 }
 0x10a   : > { %p2363_p0 = pnand %p2361_p13, %p2757_p7 }
 0x10c   : > { %p2364_p1 = pneg %p2363_p0 }
 0x10e   : > { %p2369_p2 = pnand %p2367_p3, %p2364_p1 }
 0x110   : > { %2372 = shalt.err (!%p2369_p2)
}
 0x111   : > { %s2373_s0 = scalar_lea.vmem %s481_s22, 1024  ;;  %p2381_p9 = scmp.lt.s32.totalorder %s481_s22, %s481_s22 }
 0x112   : > { %p2374_p4 = scmp.ne.s32.totalorder %s481_s22, %s2373_s0  ;;  %p2382_p10 = scmp.lt.s32.totalorder %s2373_s0, %s2373_s0 }
 0x114   : > { %p2376_p6 = pnand %p2374_p4, %p2757_p7  ;;  %p2383_p11 = por %p2382_p10, %p2381_p9 }
 0x116   : > { %p2377_p8 = pneg %p2376_p6 }
 0x118   : > { %p2384_p12 = pnand %p2383_p11, %p2377_p8 }
 0x11a   : > { %2387 = shalt.err (!%p2384_p12)
}
 0x11b   : > { %1994 = dma.hbm_to_vmem [thread:$0]  (!%p2741_p5), %s3276_s10, 1024, %s481_s22, [#allocation19], %s3314_s26, %s3314_s26, %s2608_s20  }
 0x11c   : > { %s2388_s27 = scalar_lea.hbm %s3278_s12, 16 }
 0x11d   : > { %p2389_p13 = scmp.ne.s32.totalorder %s3278_s12, %s2388_s27  ;;  %p2395_p3 = scmp.lt.u32.totalorder %s2388_s27, %s3278_s12 }
 0x11f   : > { %p2391_p0 = pnand %p2389_p13, %p2757_p7 }
 0x121   : > { %p2392_p1 = pneg %p2391_p0 }
 0x123   : > { %p2397_p2 = pnand %p2395_p3, %p2392_p1 }
 0x125   : > { %2400 = shalt.err (!%p2397_p2)
}
 0x126   : > { %s2401_s18 = scalar_lea.vmem %s506_s1, 16  ;;  %s2408_s20 = scalar_lea.vmem %s506_s1, 32 }
 0x127   : > { %p2402_p4 = scmp.ne.s32.totalorder %s506_s1, %s2401_s18  ;;  %p2409_p9 = scmp.lt.s32.totalorder %s506_s1, %s506_s1 }
 0x128   : > { %p2410_p10 = scmp.lt.s32.totalorder %s2408_s20, %s2401_s18 }
 0x129   : > { %p2404_p6 = pnand %p2402_p4, %p2757_p7 }
 0x12a   : > { %p2411_p11 = por %p2410_p10, %p2409_p9 }
 0x12b   : > { %p2405_p8 = pneg %p2404_p6 }
 0x12d   : > { %p2412_p12 = pnand %p2411_p11, %p2405_p8 }
 0x12f   : > { %2415 = shalt.err (!%p2412_p12)
}
 0x130   : > { %2000 = dma.hbm_to_vmem [thread:$0]  (!%p2741_p5), %s3278_s12, 16, %s506_s1, [#allocation22]  }
 0x131   : > { %s2617_s0 = smov [#allocation24]   ;;  %s2416_s25 = scalar_lea.hbm %s3279_s13, 16 }
 0x132   : > { %s516_s28 = sshll.u32 %s2617_s0, 4  ;;  %p2417_p13 = scmp.ne.s32.totalorder %s3279_s13, %s2416_s25  ;;  %s517_s28 = int_to_ptr.vmem [resolvable:$true] %s516_s28 }
 0x133   : > { %p2423_p3 = scmp.lt.u32.totalorder %s2416_s25, %s3279_s13 }
 0x134   : > { %p2419_p0 = pnand %p2417_p13, %p2757_p7 }
 0x136   : > { %p2420_p1 = pneg %p2419_p0 }
 0x138   : > { %p2425_p2 = pnand %p2423_p3, %p2420_p1 }
 0x13a   : > { %2428 = shalt.err (!%p2425_p2)
}
 0x13b   : > { %s2429_s1 = scalar_lea.vmem %s517_s28, 16  ;;  %s2436_s14 = scalar_lea.vmem %s517_s28, 32 }
 0x13c   : > { %p2430_p4 = scmp.ne.s32.totalorder %s517_s28, %s2429_s1  ;;  %p2437_p9 = scmp.lt.s32.totalorder %s517_s28, %s517_s28 }
 0x13d   : > { %p2438_p10 = scmp.lt.s32.totalorder %s2436_s14, %s2429_s1 }
 0x13e   : > { %p2432_p6 = pnand %p2430_p4, %p2757_p7 }
 0x13f   : > { %p2439_p11 = por %p2438_p10, %p2437_p9 }
 0x140   : > { %p2433_p8 = pneg %p2432_p6 }
 0x142   : > { %p2440_p12 = pnand %p2439_p11, %p2433_p8 }
 0x144   : > { %2443 = shalt.err (!%p2440_p12)
}
 0x145   : > { %s3316_s21 = sld [smem:[#allocation37_spill]]  ;;  %s3317_s26 = sld [smem:[#allocation38_spill]] }
 0x146   : > { %2003 = dma.hbm_to_vmem [thread:$0]  (!%p2741_p5), %s3279_s13, 16, %s517_s28, [#allocation25]  }
 0x147   : > { %s1719_s22 = sadd.s32 4294967294, %s2602_s16   ;;  %s3002_s23 = sadd.s32 1, %s2602_s16  }
 0x148   : > { %s43_s0 = ssub.s32 %s2602_s16, %s3002_s23  ;;  %s46_s24 = sadd.s32 1, %s2598_s15 }
 0x149   : > { %p44_p7 = scmp.eq.s32.totalorder %s43_s0, 0  ;;  %p53_p13 = scmp.ne.s32.totalorder %s2598_s15, %s2594_s30 }
 0x14a   : > { %p54_p0 = scmp.eq.s32.totalorder %s2602_s16, 0  ;;  %p367_p6 = scmp.eq.s32.totalorder %s1719_s22, 3 }
 0x14b   : > { %p59_p1 = scmp.ne.s32.totalorder %s2594_s30, %s3316_s21  ;;  %p3319_p2 = scmp.eq.s32.totalorder %s3317_s26, 0 }
 0x14c   : > { %s3013_s2 = scalar_select %p44_p7, %s2598_s15, %s46_s24  }
 0x14d   : > { %p3015_p3 = por %p54_p0, %p53_p13  ;;  %p3021_p5 = por %p3319_p2, %p59_p1 }
 0x14e   : > { %p361_p4 = scmp.eq.s32.totalorder %s3317_s26, 3  ;;  %p2027_p8 = scmp.lt.s32.totalorder %s2602_s16, 4 }
 0x14f   : > { %s3320_s28 = scalar_select %p3021_p5, 1, 0 }
 0x150   : > { %s3028_s27 = sand.u32 1, %s2598_s15   ;;  %p3030_p9 = por %p361_p4, %p53_p13 }
 0x151   : > { %p3034_p10 = por %p367_p6, %p59_p1  ;;  %s1734_s19 = sshll.u32 %s2602_s16, 4 }
 0x152   : > { %s3321_s29 = scalar_select %p3030_p9, 1, 0 }
 0x153   : > { %s3322_s17 = scalar_select %p3034_p10, 1, 0 }
 0x154   : > { %s530_s1 = scalar_lea.vmem [#allocation3], %s3028_s27  ;;  %s3323_s21 = sld [smem:[#allocation40_spill]] }
 0x155   : > { %s537_s14 = sshll.u32 %s530_s1, 4  ;;  %p3049_p11 = pnand %p2027_p8, %p3015_p3  ;;  %s3045_s14 = int_to_ptr.vmem [resolvable:$true] %s537_s14 }
 0x156   : > { %s1735_s24 = sshll.u32 %s3028_s27, 3  ;;  %s528_s1 = scalar_lea.sflag [#allocation4], %s3028_s27 }
 0x157   : > { %p2446_p7 = pneg %p3049_p11 }
 0x15a   : > { %s3043_s26 = scalar_lea.hbm %s3323_s21, %s1734_s19  ;;  %s2449_s25 = scalar_lea.hbm %s3323_s21, 64 }
 0x15b   : > { %s2444_s3 = scalar_lea.hbm %s3043_s26, 16  ;;  %p2450_p1 = scmp.lt.u32.totalorder %s3043_s26, %s3323_s21 }
 0x15c   : > { %p2445_p12 = scmp.ne.s32.totalorder %s3043_s26, %s2444_s3  ;;  %p2451_p3 = scmp.lt.u32.totalorder %s2449_s25, %s2444_s3 }
 0x15d   : > { %p2453_p4 = scmp.lt.u32.totalorder %s2444_s3, %s3043_s26 }
 0x15e   : > { %p2447_p13 = pnand %p2446_p7, %p2445_p12  ;;  %p2452_p2 = por %p2451_p3, %p2450_p1 }
 0x160   : > { %p2448_p0 = pneg %p2447_p13  ;;  %p2454_p6 = por %p2453_p4, %p2452_p2 }
 0x162   : > { %p2455_p8 = pnand %p2454_p6, %p2448_p0 }
 0x164   : > { %2458 = shalt.err (!%p2455_p8)
}
 0x165   : > { %s2459_s0 = scalar_lea.vmem %s3045_s14, 16  ;;  %s2618_s19 = smov [#allocation3]  }
 0x166   : > { %p2460_p12 = scmp.ne.s32.totalorder %s3045_s14, %s2459_s0  ;;  %s2464_s18 = sshll.u32 %s2618_s19, 4  ;;  %s2465_s18 = int_to_ptr.vmem [resolvable:$false] %s2464_s18 }
 0x167   : > { %s2466_s4 = scalar_lea.vmem %s2465_s18, 32  ;;  %p2467_p9 = scmp.lt.s32.totalorder %s3045_s14, %s2465_s18 }
 0x168   : > { %p2462_p13 = pnand %p2460_p12, %p2446_p7  ;;  %p2468_p1 = scmp.lt.s32.totalorder %s2466_s4, %s2459_s0 }
 0x16a   : > { %p2463_p10 = pneg %p2462_p13  ;;  %p2469_p3 = por %p2468_p1, %p2467_p9 }
 0x16c   : > { %p2470_p2 = pnand %p2469_p3, %p2463_p10 }
 0x16e   : > { %2473 = shalt.err (!%p2470_p2)
}
 0x16f   : > { %2007 = dma.hbm_to_vmem [thread:$0]  (!%p3049_p11), %s3043_s26, 16, %s3045_s14, %s528_s1  }
 0x170   : > { %s1736_s3 = sshll.u32 %s2602_s16, 7  ;;  %s548_s25 = scalar_lea.vmem [#allocation6], %s1735_s24 }
 0x171   : > { %s555_s20 = sshll.u32 %s548_s25, 4  ;;  %s3325_s18 = sld [smem:[#allocation41_spill]]  ;;  %s556_s20 = int_to_ptr.vmem [resolvable:$true] %s555_s20 }
 0x172   : > { %s3326_s4 = sand.u32 1, %s2602_s16  }
 0x173   : > { %s545_s6 = scalar_lea.sflag [#allocation7], %s3326_s4 }
 0x177   : > { %s3087_s0 = scalar_lea.hbm %s3325_s18, %s1736_s3  ;;  %s2479_s26 = scalar_lea.hbm %s3325_s18, 512 }
 0x178   : > { %s2474_s7 = scalar_lea.hbm %s3087_s0, 128  ;;  %p2480_p4 = scmp.lt.u32.totalorder %s3087_s0, %s3325_s18 }
 0x179   : > { %p2475_p9 = scmp.ne.s32.totalorder %s3087_s0, %s2474_s7  ;;  %p2481_p6 = scmp.lt.u32.totalorder %s2479_s26, %s2474_s7 }
 0x17a   : > { %p2483_p12 = scmp.lt.u32.totalorder %s2474_s7, %s3087_s0 }
 0x17b   : > { %p2477_p10 = pnand %p2475_p9, %p2446_p7  ;;  %p2482_p8 = por %p2481_p6, %p2480_p4 }
 0x17d   : > { %p2478_p0 = pneg %p2477_p10  ;;  %p2484_p13 = por %p2483_p12, %p2482_p8 }
 0x17f   : > { %p2485_p1 = pnand %p2484_p13, %p2478_p0 }
 0x181   : > { %2488 = shalt.err (!%p2485_p1)
}
 0x182   : > { %s2489_s1 = scalar_lea.vmem %s556_s20, 128  ;;  %s2619_s3 = smov [#allocation6]  }
 0x183   : > { %p2490_p3 = scmp.ne.s32.totalorder %s556_s20, %s2489_s1  ;;  %s2494_s25 = sshll.u32 %s2619_s3, 4  ;;  %s2495_s25 = int_to_ptr.vmem [resolvable:$false] %s2494_s25 }
 0x184   : > { %s2496_s19 = scalar_lea.vmem %s2495_s25, 256  ;;  %p2497_p10 = scmp.lt.s32.totalorder %s556_s20, %s2495_s25 }
 0x185   : > { %p2492_p2 = pnand %p2490_p3, %p2446_p7  ;;  %p2498_p5 = scmp.lt.s32.totalorder %s2496_s19, %s2489_s1 }
 0x187   : > { %p2493_p9 = pneg %p2492_p2  ;;  %p2499_p4 = por %p2498_p5, %p2497_p10 }
 0x189   : > { %p2500_p6 = pnand %p2499_p4, %p2493_p9 }
 0x18b   : > { %2503 = shalt.err (!%p2500_p6)
}
 0x18c   : > { %2010 = dma.hbm_to_vmem [thread:$0]  (!%p3049_p11), %s3087_s0, 128, %s556_s20, %s545_s6  }
 0x18d   : > { %s3327_s7 = sld [smem:[#allocation39_spill]] }
 0x193   : > { %p3328_p0 = scmp.ne.s32.totalorder %s3327_s7, 0 }
 0x194   : > { %s3113_s4 = sand.u32 (!%p3328_p0), 1, %s2594_s30   ;;  %p3329_p7 = scmp.ne.s32.totalorder (!%p3328_p0), %s3320_s28, 0 }
 0x195   : > { %564 = sbr.rel (%p3328_p0) target bundleno = 2829 (0xb0d), region = 76  ;;  %s567_s27 = scalar_lea.sflag (!%p3328_p0), [#allocation4], %s3113_s4 }
 0x196   : > { %s569_s14 = scalar_lea.vmem (!%p3328_p0), [#allocation3], %s3113_s4 }
 0x19c   : > { %2549 = dma.done.wait (%p3329_p7), %s567_s27, 16  }
 0x19d   : > { %2551 = vsyncadd (%p3329_p7), %s567_s27, 4294967280  ;;  %s3330_s26 = sld [smem:[#allocation38_spill]]  ;;  %s1738_s22 = sshll.u32 %s3113_s4, 3 }
 0x19e   : > { %s3125_s0 = scalar_lea.vmem [#allocation6], %s1738_s22 }
 0x1a3   : > { %s574_s6 = sand.u32 1, %s3330_s26  }
 0x1a4   : > { %s575_s20 = scalar_lea.sflag [#allocation7], %s574_s6 }
 0x1a5   : > { %2553 = dma.done.wait (%p3329_p7), %s575_s20, 128  }
 0x1a6   : > { %2555 = vsyncadd (%p3329_p7), %s575_s20, 4294967168  ;;  %p3331_p5 = scmp.eq.s32.totalorder %s3330_s26, 0 }
 0x1a8   : > { %2557 = dma.done.wait (%p3331_p5), [#allocation7], 512   ;;  %p3332_p11 = pmov %p3331_p5 }
 0x1a9   : > { %p3333_p8 = pmov %p3331_p5 }
 0x1aa   : > { %2559 = vsyncadd (%p3332_p11), [#allocation7], 4294966784 }
 0x1ab   : > { %2561 = dma.done.wait (%p3333_p8), [#allocation10], 528   ;;  %p3334_p12 = pmov %p3331_p5 }
 0x1ac   : > { %p3335_p13 = pmov %p3331_p5 }
 0x1ad   : > { %2563 = vsyncadd (%p3334_p12), [#allocation10], 4294966768 }
 0x1ae   : > { %2565 = dma.done.wait (%p3335_p13), [#allocation13], 32   ;;  %p3336_p1 = pmov %p3331_p5 }
 0x1b0   : > { %2567 = vsyncadd (%p3336_p1), [#allocation13], 4294967264  ;;  %p3337_p3 = pmov %p3336_p1 }
 0x1b1   : > { %p3338_p2 = pmov %p3336_p1 }
 0x1b2   : > { %2569 = dma.done.wait (%p3337_p3), [#allocation16], 528  }
 0x1b3   : > { %2571 = vsyncadd (%p3338_p2), [#allocation16], 4294966768  ;;  %p3339_p9 = pmov %p3336_p1 }
 0x1b4   : > { %p3340_p10 = pmov %p3336_p1 }
 0x1b5   : > { %2573 = dma.done.wait (%p3339_p9), [#allocation19], 1040  }
 0x1b6   : > { %2575 = vsyncadd (%p3340_p10), [#allocation19], 4294966256  ;;  %p3341_p4 = pmov %p3336_p1 }
 0x1b7   : > { %p3342_p6 = pmov %p3336_p1 }
 0x1b8   : > { %2577 = dma.done.wait (%p3341_p4), [#allocation22], 32  }
 0x1b9   : > { %2579 = vsyncadd (%p3342_p6), [#allocation22], 4294967264  ;;  %p3343_p0 = pmov %p3336_p1 }
 0x1bb   : > { %2581 = dma.done.wait (%p3343_p0), [#allocation25], 16   ;;  %p3344_p7 = pmov %p3343_p0 }
 0x1bc   : > { %v2620_v0 = vmov 0.0|0.0   ;;  %vm2621_vm0 = vmmov 0   ;;  %v2622_v1 = vmov 0.0   ;;  %v678_v2 = vld [vmem:[#allocation8] sm:$0xff]  ;;  %v679_v3 = vld [vmem:[#allocation8 + $0x8] sm:$0xff]  ;;  %v680_v4 = vld [vmem:[#allocation8 + $0x10] sm:$0xff]  ;;  %v846_v17 = vlaneseq }
 0x1bd   : > { %2583 = vsyncadd (%p3344_p7), [#allocation25], 4294967280  ;;  %1883 = vmatprep.subr.bf16.mxu0 %v2620_v0  ;;  %1816 = vmatprep.mubr.msk.f32.mxu0 %vm2621_vm0, %v2622_v1  ;;  %v1884_v5 = vpack.c.bf16 %v679_v3, %v678_v2  ;;  %v681_v6 = vld [vmem:[#allocation8 + $0x18] sm:$0xff]  ;;  %vm689_vm1 = vcmask 261120   ;;  %v1752_v9 = vld [vmem:[#allocation9] ss:$0 sm:$0xff] }
 0x1be   : > { %1824 = vmatprep.subr.mxu1 %v2622_v1  ;;  %1826 = vmatprep.mubr.msk.f32.mxu1 %vm2621_vm0, %v2622_v1  ;;  %v1887_v7 = vpack.c.bf16 %v681_v6, %v680_v4  ;;  %v3167_v8 = vld [vmem:[%s3125_s0] sm:$0xff]  ;;  %vm763_vm2 = vcmask 785408   ;;  %s2623_s28 = smov 112   ;;  %s2624_s5 = smov 96   ;;  %vm769_vm3 = vcmask 130048   ;;  %v847_v19 = vshrl.u32 %v846_v17, 7 }
 0x1bf   : > { %1885 = vmatpush3.bf16.msra.mxu0 %v1884_v5  ;;  %s2625_s24 = smov 80   ;;  %v676_v18 = vld [vmem:[%s569_s14] sm:$0x1]  ;;  %v2626_v21 = vmov 0   ;;  %vm852_vm6 = vcmask 64512   ;;  %s2627_s1 = smov 48  }
 0x1c0   : > { %1886 = vmatprep.subr.bf16.mxu0 %v2620_v0  ;;  %vm677_vm4 = vcmp.eq.s32.totalorder %v676_v18, 0  ;;  %v848_v20 = vsub.s32 0, %v847_v19  ;;  %s2628_s3 = smov 64   ;;  %v940_v49 = vld [vmem:[#allocation11] sm:$0xff]  ;;  %v941_v50 = vld [vmem:[#allocation11 + $0x8] sm:$0xff]  ;;  %v1109_v55 = vld [vmem:[#allocation11 + $0x10] sm:$0xff] }
 0x1c1   : > { %v845_v22 = vsel %vm677_vm4, 1, %v2626_v21  ;;  %v1893_v53 = vpack.c.bf16 %v941_v50, %v940_v49  ;;  %v1110_v56 = vld [vmem:[#allocation11 + $0x18] sm:$0xff]  ;;  %v1762_v3 = vld [vmem:[#allocation12] ss:$0 sm:$0xff]  ;;  %vm1396_vm7 = vcmask 523264   ;;  %s1772_s25 = sshll.u32 %s3330_s26, 7 }
 0x1c2   : > { %v849_v23 = vrot.slane %v845_v22, %v848_v20  ;;  %v1890_v57 = vpack.c.bf16 %v1110_v56, %v1109_v55  ;;  %v1298_v17 = vld [vmem:[#allocation17 + $0x10] sm:$0xff]  ;;  %v1299_v18 = vld [vmem:[#allocation17 + $0x18] sm:$0xff]  ;;  %s674_s19 = scalar_lea.vmem [#allocation26], %s1738_s22  ;;  %s3345_s6 = sld [smem:[#allocation48_spill]] }
 0x1c3   : > { %1888 = vmatpush3.bf16.msra.mxu0 %v1887_v7  ;;  %v1899_v19 = vpack.c.bf16 %v1299_v18, %v1298_v17  ;;  %v1382_v20 = vld [vmem:[#allocation20 + $0x8] sm:$0xff]  ;;  %v1383_v21 = vld [vmem:[#allocation20 + $0x10] sm:$0xff]  ;;  %s1515_s7 = sshll.u32 %s674_s19, 4  ;;  %s1502_s0 = scalar_lea.sflag [#allocation5], %s3113_s4  ;;  %s3224_s7 = int_to_ptr.vmem [resolvable:$true] %s1515_s7 }
 0x1c4   : > { %1819 = vmatprep.subr.mxu0 %v2622_v1  ;;  %vm850_vm5 = vcmp.eq.s32.totalorder %v849_v23, 1  ;;  %v1384_v23 = vld [vmem:[#allocation20 + $0x18] sm:$0xff]  ;;  %p3346_p11 = scmp.ne.s32.totalorder %s3321_s29, 0  ;;  %s2629_s26 = smov [#allocation26]  }
 0x1c5   : > { %s2508_s22 = sshll.u32 %s2629_s26, 4  ;;  %s2509_s22 = int_to_ptr.vmem [resolvable:$false] %s2508_s22 }
 0x1c6   : > { %1817 = vmatmul.mubr.msk.f32.vlgmr.msra.gmra.mrb[0].mxu0 %vm689_vm1, %v3167_v8  ;;  %p2511_p13 = scmp.lt.s32.totalorder %s3224_s7, %s2509_s22 }
 0x1c7   : > { %1821 = vmatprep.mubr.msk.f32.mxu0 %vm2621_vm0, %v2622_v1 }
 0x1c8   : > { %s3222_s20 = scalar_lea.hbm %s3345_s6, %s1772_s25 }
 0x299   : > { %v759_v10 = vpop.f32.mrb[0].mxu0 }
 0x29a   : > { %v760_v11 = vadd.f32 %v1752_v9, %v759_v10  ;;  %v1818_v12 = vpop.f32.mrb[1].mxu0 }
 0x29c   : > { %764 = vst.msk [vmem:[#allocation2] sm:$0xff] %vm763_vm2, %v760_v11 }
 0x2a3   : > { %v765_v13 = vld [vmem:[#allocation2] sm:$0xff] }
 0x2a4   : > { %942 = vrot.lane.b32.xlu1 %v765_v13, %s2623_s28  ;;  %767 = vrot.lane.b32.xlu0 %v765_v13, %s2624_s5  ;;  %s2504_s28 = scalar_lea.vmem %s3224_s7, 128  ;;  %s2510_s5 = scalar_lea.vmem %s2509_s22, 256 }
 0x2a5   : > { %p2505_p5 = scmp.ne.s32.totalorder %s3224_s7, %s2504_s28  ;;  %p2512_p1 = scmp.lt.s32.totalorder %s2510_s5, %s2504_s28 }
 0x2a7   : > { %p2506_p8 = pnand %p2505_p5, %p3346_p11  ;;  %p2513_p3 = por %p2512_p1, %p2511_p13 }
 0x2a8   : > { %944 = vrot.lane.b32.xlu0 %v765_v13, %s2625_s24 }
 0x2a9   : > { %p2507_p12 = pneg %p2506_p8 }
 0x2ab   : > { %p2514_p2 = pnand %p2513_p3, %p2507_p12 }
 0x316   : > { %v768_v14 = vpop.permute.xlu0 %767  ;;  %v943_v16 = vpop.permute.xlu1 %942 }
 0x317   : > { %1820 = vmatpush3.xpose.msk.msra.mxu0 %vm769_vm3, %v768_v14 }
 0x318   : > { %1829 = vmatprep.subr.mxu0 %v2622_v1 }
 0x31a   : > { %1822 = vmatmul.mubr.msk.f32.vlgmr.msra.gmra.mrb[2].mxu0 %vm769_vm3, %v765_v13  ;;  %v945_v15 = vpop.permute.xlu0 %944 }
 0x31b   : > { %1830 = vmatpush3.xpose.msk.msra.mxu0 %vm769_vm3, %v945_v15  ;;  %1831 = vmatprep.mubr.msk.f32.mxu0 %vm2621_vm0, %v2622_v1  ;;  %v1297_v15 = vld [vmem:[#allocation17 + $0x8] sm:$0xff] }
 0x31c   : > { %1889 = vmatprep.subr.bf16.mxu0 %v2620_v0 }
 0x31e   : > { %1832 = vmatmul.mubr.msk.f32.vlgmr.msra.gmra.mrb[4].mxu0 %vm769_vm3, %v943_v16 }
 0x31f   : > { %1843 = vmatprep.mubr.msk.f32.mxu0 %vm2621_vm0, %v2622_v1  ;;  %1891 = vmatpush3.bf16.msra.mxu0 %v1890_v57 }
 0x320   : > { %1895 = vmatprep.subr.bf16.mxu0 %v2620_v0 }
 0x3ed   : > { %v840_v24 = vpop.f32.mrb[2].mxu0 }
 0x3ee   : > { %v844_v25 = vmul.f32 0.25, %v840_v24  ;;  %v1823_v26 = vpop.f32.mrb[3].mxu0  ;;  %v1905_v24 = vpack.c.bf16 %v1384_v23, %v1383_v21 }
 0x3ef   : > { %v1386_v26 = vld [vmem:[#allocation20 + $0x28] sm:$0xff] }
 0x3f0   : > { %v851_v27 = vsel %vm850_vm5, -1e+09, %v844_v25  ;;  %v1385_v25 = vld [vmem:[#allocation20 + $0x20] sm:$0xff] }
 0x3f1   : > { %v1016_v28 = vpop.f32.mrb[4].mxu0  ;;  %v853_v29 = vsel %vm852_vm6, %v851_v27, -inf }
 0x3f2   : > { %v1020_v30 = vmul.f32 0.25, %v1016_v28  ;;  %854 = vmax.xlane.f32.xlu1 %v853_v29  ;;  %v1833_v31 = vpop.f32.mrb[5].mxu0 }
 0x3f4   : > { %v1021_v32 = vsel %vm850_vm5, -1e+09, %v1020_v30 }
 0x3f5   : > { %v1022_v33 = vsel %vm852_vm6, %v1021_v32, -inf }
 0x3f6   : > { %1023 = vmax.xlane.f32.xlu0 %v1022_v33 }
 0x47f   : > { %v855_v34 = vpop.xlane.xlu1 %854 }
 0x480   : > { %v856_v35 = vsub.f32 %v851_v27, %v855_v34  ;;  %v1908_v27 = vpack.c.bf16 %v1386_v26, %v1385_v25  ;;  %v1764_v34 = vld [vmem:[#allocation15] ss:$0 sm:$0xff] }
 0x482   : > { %v857_v36 = vmul.f32 1.442695, %v856_v35 }
 0x483   : > { %v1024_v37 = vpop.xlane.xlu0 %1023 }
 0x484   : > { %2096 = vpow2.f32 %v857_v36  ;;  %v1025_v38 = vsub.f32 %v1021_v32, %v1024_v37  ;;  %v1763_v32 = vld [vmem:[#allocation14] ss:$0 sm:$0xff]  ;;  %v1387_v37 = vld [vmem:[#allocation20 + $0x30] sm:$0xff] }
 0x486   : > { %v1026_v39 = vmul.f32 1.442695, %v1025_v38  ;;  %v1388_v38 = vld [vmem:[#allocation20 + $0x38] sm:$0xff] }
 0x488   : > { %2098 = vpow2.f32 %v1026_v39  ;;  %v1911_v39 = vpack.c.bf16 %v1388_v38, %v1387_v37 }
 0x48e   : > { %v2097_v40 = vpop.eup %2096 }
 0x48f   : > { %v859_v41 = vsel %vm852_vm6, %v2097_v40, 0.0 }
 0x490   : > { %860 = vadd.xlane.f32.xlu0 %v859_v41 }
 0x492   : > { %v2099_v42 = vpop.eup %2098 }
 0x493   : > { %v1028_v43 = vsel %vm852_vm6, %v2099_v42, 0.0 }
 0x494   : > { %1029 = vadd.xlane.f32.xlu1 %v1028_v43 }
 0x4a5   : > { %1033 = vrot.lane.b32.xlu1 %v765_v13, %s2627_s1 }
 0x4a6   : > { %864 = vrot.lane.b32.xlu0 %v765_v13, %s2628_s3 }
 0x51d   : > { %v861_v44 = vpop.xlane.xlu0 %860 }
 0x51e   : > { %2100 = vrcp.f32 %v861_v44  ;;  %v1767_v44 = vld [vmem:[#allocation21] ss:$0 sm:$0xff] }
 0x521   : > { %v1030_v45 = vpop.xlane.xlu1 %1029  ;;  %v865_v46 = vpop.permute.xlu0 %864 }
 0x522   : > { %2102 = vrcp.f32 %v1030_v45  ;;  %1825 = vmatpush3.msra.mxu1 %v865_v46 }
 0x523   : > { %1834 = vmatprep.subr.mxu1 %v2622_v1 }
 0x525   : > { %v1034_v51 = vpop.permute.xlu1 %1033 }
 0x528   : > { %v2101_v47 = vpop.eup %2100 }
 0x529   : > { %v863_v48 = vmul.f32 %v2101_v47, %v2097_v40  ;;  %v1765_v40 = vld [vmem:[#allocation18] ss:$0 sm:$0xff] }
 0x52b   : > { %1827 = vmatmul.mubr.msk.f32.vlgmr.msra.gmra.mrb[0].mxu1 %vm852_vm6, %v863_v48 }
 0x52c   : > { %v2103_v52 = vpop.eup %2102  ;;  %1835 = vmatpush3.msra.mxu1 %v1034_v51  ;;  %1836 = vmatprep.mubr.msk.f32.mxu1 %vm2621_vm0, %v2622_v1 }
 0x52d   : > { %v1032_v54 = vmul.f32 %v2103_v52, %v2099_v42  ;;  %1892 = vmatprep.subr.bf16.mxu1 %v2620_v0 }
 0x52f   : > { %1837 = vmatmul.mubr.msk.f32.vlgmr.msra.gmra.mrb[2].mxu1 %vm852_vm6, %v1032_v54 }
 0x530   : > { %1894 = vmatpush3.bf16.msra.mxu1 %v1893_v53  ;;  %1850 = vmatprep.mubr.msk.f32.mxu1 %vm2621_vm0, %v2622_v1 }
 0x531   : > { %1901 = vmatprep.subr.bf16.mxu1 %v2620_v0 }
 0x5fe   : > { %v936_v58 = vpop.f32.mrb[0].mxu1 }
 0x5ff   : > { %v1828_v59 = vpop.f32.mrb[1].mxu1  ;;  %1851 = vmatmul.mubr.msk.f32.vlgmr.msra.gmra.mrb[4].mxu1 %vm769_vm3, %v936_v58 }
 0x600   : > { %1880 = vmatprep.mubr.msk.f32.mxu1 %vm2621_vm0, %v2622_v1  ;;  %v1769_v59 = vld [vmem:[#allocation23] ss:$0 sm:$0xff] }
 0x602   : > { %v1105_v60 = vpop.f32.mrb[2].mxu1 }
 0x603   : > { %v1838_v61 = vpop.f32.mrb[3].mxu1  ;;  %1844 = vmatmul.mubr.msk.f32.vlgmr.msra.gmra.mrb[6].mxu0 %vm769_vm3, %v1105_v60 }
 0x604   : > { %1861 = vmatprep.mubr.msk.f32.mxu0 %vm2621_vm0, %v2622_v1  ;;  %v1296_v1 = vld [vmem:[#allocation17] sm:$0xff] }
 0x605   : > { %v1896_v16 = vpack.c.bf16 %v1297_v15, %v1296_v1  ;;  %v1770_v61 = vld [vmem:[#allocation24] ss:$0 sm:$0xff] }
 0x607   : > { %1897 = vmatpush3.bf16.msra.mxu0 %v1896_v16 }
 0x608   : > { %1898 = vmatprep.subr.bf16.mxu0 %v2620_v0 }
 0x60b   : > { %1900 = vmatpush3.bf16.msra.mxu0 %v1899_v19 }
 0x6d2   : > { %v1253_v62 = vpop.f32.mrb[4].mxu1 }
 0x6d3   : > { %v1852_v63 = vpop.f32.mrb[5].mxu1 }
 0x6d6   : > { %v1180_v2 = vpop.f32.mrb[6].mxu0 }
 0x6d7   : > { %v1254_v4 = vadd.f32 %v1253_v62, %v1180_v2  ;;  %v1845_v5 = vpop.f32.mrb[7].mxu0 }
 0x6d9   : > { %v1264_v6 = vadd.f32 %v1762_v3, %v1254_v4 }
 0x6db   : > { %v1265_v7 = vadd.f32 %v1264_v6, %v3167_v8  ;;  %v1381_v8 = vld [vmem:[#allocation20] sm:$0xff] }
 0x6dc   : > { %v1902_v22 = vpack.c.bf16 %v1382_v20, %v1381_v8 }
 0x6dd   : > { %v1268_v9 = vsel %vm689_vm1, %v1265_v7, 0.0 }
 0x6de   : > { %1269 = vadd.xlane.f32.xlu1 %v1268_v9  ;;  %1903 = vmatpush3.bf16.msra.mxu1 %v1902_v22 }
 0x6df   : > { %1904 = vmatprep.subr.bf16.mxu1 %v2620_v0 }
 0x6e2   : > { %1906 = vmatpush3.bf16.msra.mxu1 %v1905_v24 }
 0x6e3   : > { %1907 = vmatprep.subr.bf16.mxu1 %v2620_v0 }
 0x6e6   : > { %1909 = vmatpush3.bf16.msra.mxu1 %v1908_v27 }
 0x6e7   : > { %1910 = vmatprep.subr.bf16.mxu1 %v2620_v0 }
 0x6ea   : > { %1912 = vmatpush3.bf16.msra.mxu1 %v1911_v39 }
 0x76b   : > { %v1270_v10 = vpop.xlane.xlu1 %1269 }
 0x76c   : > { %v1272_v11 = vmul.f32 0.03125, %v1270_v10 }
 0x76e   : > { %v1273_v12 = vsub.f32 %v1265_v7, %v1272_v11 }
 0x770   : > { %v1274_v13 = vmul.f32 %v1273_v12, %v1273_v12 }
 0x772   : > { %v1275_v14 = vsel %vm689_vm1, %v1274_v13, 0.0 }
 0x773   : > { %1276 = vadd.xlane.f32.xlu0 %v1275_v14 }
 0x800   : > { %v1277_v28 = vpop.xlane.xlu0 %1276 }
 0x801   : > { %v1278_v29 = vmul.f32 0.03125, %v1277_v28 }
 0x803   : > { %v1279_v30 = vadd.f32 1e-05, %v1278_v29 }
 0x805   : > { %2104 = vrsqrt.f32 %v1279_v30 }
 0x80f   : > { %v2105_v31 = vpop.eup %2104 }
 0x810   : > { %v1281_v33 = vmul.f32 %v2105_v31, %v1273_v12 }
 0x812   : > { %v1288_v35 = vmul.f32 %v1763_v32, %v1281_v33 }
 0x814   : > { %v1295_v36 = vadd.f32 %v1764_v34, %v1288_v35 }
 0x816   : > { %1862 = vmatmul.mubr.msk.f32.vlgmr.msra.gmra.mrb[8].mxu0 %vm689_vm1, %v1295_v36 }
 0x8e9   : > { %v1376_v41 = vpop.f32.mrb[8].mxu0 }
 0x8ea   : > { %v1377_v42 = vadd.f32 %v1765_v40, %v1376_v41  ;;  %v1863_v0 = vpop.f32.mrb[9].mxu0 }
 0x8ec   : > { %v1380_v43 = vmax.f32 %v1377_v42, 0.0 }
 0x8ee   : > { %1881 = vmatmul.mubr.msk.f32.vlgmr.msra.gmra.mrb[6].mxu1 %vm1396_vm7, %v1380_v43 }
 0x9c1   : > { %v1466_v45 = vpop.f32.mrb[6].mxu1 }
 0x9c2   : > { %v1467_v46 = vadd.f32 %v1767_v44, %v1466_v45  ;;  %v1882_v47 = vpop.f32.mrb[7].mxu1 }
 0x9c4   : > { %v1470_v48 = vadd.f32 %v1467_v46, %v1295_v36 }
 0x9c6   : > { %v1473_v49 = vsel %vm689_vm1, %v1470_v48, 0.0 }
 0x9c7   : > { %1474 = vadd.xlane.f32.xlu0 %v1473_v49 }
 0xa54   : > { %v1475_v50 = vpop.xlane.xlu0 %1474 }
 0xa55   : > { %v1476_v51 = vmul.f32 0.03125, %v1475_v50 }
 0xa57   : > { %v1477_v52 = vsub.f32 %v1470_v48, %v1476_v51 }
 0xa59   : > { %v1478_v53 = vmul.f32 %v1477_v52, %v1477_v52 }
 0xa5b   : > { %v1479_v54 = vsel %vm689_vm1, %v1478_v53, 0.0 }
 0xa5c   : > { %1480 = vadd.xlane.f32.xlu1 %v1479_v54 }
 0xae9   : > { %v1481_v55 = vpop.xlane.xlu1 %1480 }
 0xaea   : > { %v1482_v56 = vmul.f32 0.03125, %v1481_v55 }
 0xaec   : > { %v1483_v57 = vadd.f32 1e-05, %v1482_v56 }
 0xaee   : > { %2106 = vrsqrt.f32 %v1483_v57 }
 0xaf8   : > { %v2107_v58 = vpop.eup %2106 }
 0xaf9   : > { %v1485_v60 = vmul.f32 %v2107_v58, %v1477_v52 }
 0xafb   : > { %v1492_v62 = vmul.f32 %v1769_v59, %v1485_v60 }
 0xafd   : > { %v1499_v63 = vadd.f32 %v1770_v61, %v1492_v62 }
 0xaff   : > { %1500 = vst.msk [vmem:[%s674_s19] sm:$0xff] %vm689_vm1, %v1499_v63 }
 0xb00   : > { %2517 = shalt.err (!%p2514_p2)
}
 0xb01   : > { %s2518_s4 = scalar_lea.hbm %s3222_s20, 128  ;;  %s2522_s3 = scalar_lea.hbm %s3345_s6, 512 }
 0xb02   : > { %p2519_p9 = scmp.ne.s32.totalorder %s3222_s20, %s2518_s4  ;;  %p2523_p6 = scmp.lt.u32.totalorder %s3222_s20, %s3345_s6 }
 0xb03   : > { %p2524_p0 = scmp.lt.u32.totalorder %s2522_s3, %s2518_s4  ;;  %p2526_p5 = scmp.lt.u32.totalorder %s2518_s4, %s3222_s20 }
 0xb04   : > { %p2520_p10 = pnand %p2519_p9, %p3346_p11 }
 0xb05   : > { %p2525_p7 = por %p2524_p0, %p2523_p6 }
 0xb06   : > { %p2521_p4 = pneg %p2520_p10 }
 0xb07   : > { %p2527_p8 = por %p2526_p5, %p2525_p7 }
 0xb09   : > { %p2528_p12 = pnand %p2527_p8, %p2521_p4 }
 0xb0b   : > { %2531 = shalt.err (!%p2528_p12)
}
 0xb0c   : > { %1965 = dma.vmem_to_hbm [thread:$0]  (%p3346_p11), %s3224_s7, 128, %s3222_s20, %s1502_s0  }
 0xb0d PF: > { %s3347_s27 = sld [smem:[#allocation37_spill]]  ;;  %p2040_p13 = scmp.ge.s32.totalorder %s2602_s16, 2 }
 0xb0e   : > { %p3348_p1 = scmp.ne.s32.totalorder %s3322_s17, 0 }
 0xb10   : > { %p2012_p3 = pnand %p2040_p13, %p3348_p1 }
 0xb13   : > { %s1527_s14 = sand.u32 1, %s3347_s27  }
 0xb14   : > { %s1528_s28 = scalar_lea.sflag [#allocation5], %s1527_s14 }
 0xb15   : > { %2585 = dma.done.wait (!%p2012_p3), %s1528_s28, 128  }
 0xb16   : > { %2587 = vsyncadd (!%p2012_p3), %s1528_s28, 4294967168  ;;  %p36_p2 = scmp.ge.s32.totalorder %s3002_s23, 6   ;;  %s3349_s29 = smov %s2594_s30 }
 0xb17   : > { %s3350_s30 = smov %s2598_s15  ;;  %s3351_s15 = smov %s3013_s2 }
 0xb18   : > { %s3352_s16 = smov %s3002_s23  ;;  %38 = sbr.rel (!%p36_p2) target bundleno = 23 (0x17), region = 182 }
 0xb1f   :  { %1533 = vsyncpa [#allocation4], 1 }
 0xb20   :  { %1535 = vsyncpa [#allocation4 + $0x1], 1 }
 0xb21   :  { %1536 = vsyncpa [#allocation7], 1 }
 0xb22   :  { %1538 = vsyncpa [#allocation7 + $0x1], 1 }
 0xb23   :  { %1539 = vsyncpa [#allocation10], 1 }
 0xb24   :  { %1540 = vsyncpa [#allocation13], 1 }
 0xb25   :  { %1541 = vsyncpa [#allocation16], 1 }
 0xb26   :  { %1542 = vsyncpa [#allocation19], 1 }
 0xb27   :  { %1543 = vsyncpa [#allocation22], 1 }
 0xb28   :  { %1544 = vsyncpa [#allocation25], 1 }
 0xb29   :  { %1545 = vsyncpa [#allocation5], 1 }
 0xb2a   :  { %1547 = vsyncpa [#allocation5 + $0x1], 1 }

</bundles_post_ra>
